<compile_context>
chip_gen: v6e
topology: v6e:2x2x1
jax: 0.10.0
libtpu: 0.0.40
codegen_flags: <defaults>
</compile_context>

<pallas_src>
import jax
import jax.numpy as jnp
from jax.experimental import pallas as pl
from jax.experimental.pallas import tpu as pltpu


def _translation_kernel(valid_ref, x_ref, w_ref, b_ref, mask_ref, o_ref):
    # valid_ref : (n_row_tiles,) int32 SMEM -- 1 iff this row tile has any unmasked token
    # x_ref     : (TM, E)  bf16   token embeddings (row tile)
    # w_ref     : (E, V)   bf16   projection weights for current fertility slot
    # b_ref     : (1, V)   f32    bias for current fertility slot
    # mask_ref  : (TM, 1)  f32    0/1 token mask (row tile)
    # o_ref     : (TM, V)  f32/bf16  masked log-probs block of the (M, Fp1*V) output
    i = pl.program_id(1)

    @pl.when(valid_ref[i] > 0)
    def _compute():
        logits = jnp.dot(x_ref[...], w_ref[...],
                         preferred_element_type=jnp.float32) + b_ref[...]
        if o_ref.dtype == jnp.float32:
            # Reuse the output block as the logits scratch buffer: avoids a
            # separate (tile_m, V) f32 VMEM temporary.
            o_ref[...] = logits
            logits = o_ref[...]
        # numerically stable log_softmax over the vocab (lane) axis, all in f32
        m = jnp.max(logits, axis=-1, keepdims=True)
        shifted = logits - m
        lse = jnp.log(jnp.sum(jnp.exp(shifted), axis=-1, keepdims=True))
        o_ref[...] = ((shifted - lse) * mask_ref[...]).astype(o_ref.dtype)

    @pl.when(valid_ref[i] == 0)
    def _skip():
        o_ref[...] = jnp.zeros_like(o_ref)


def _vmem_capacity_bytes():
    try:
        info = pltpu.get_tpu_info()
        cap = int(getattr(info, "vmem_capacity_bytes", 0))
        if cap > 0:
            return cap
    except Exception:
        pass
    return 64 << 20  # conservative fallback (v7x-sized)


def _device_kind():
    try:
        return jax.devices()[0].device_kind.lower()
    except Exception:
        return ""


def _vmem_need_bytes(tile_m, E, V, w_buffers, out_itemsize):
    w_bytes = w_buffers * E * V * 2              # bf16 weight slab(s)
    x_bytes = 2 * tile_m * E * 2                 # double-buffered bf16 activations
    b_bytes = 2 * V * 4                          # double-buffered f32 bias row
    m_bytes = 2 * tile_m * 4                     # double-buffered f32 mask column
    o_bytes = 2 * tile_m * V * out_itemsize      # double-buffered output block
    tmp_bytes = 3 * tile_m * V * 4 + 8 * tile_m * 4  # softmax temporaries + row stats
    return w_bytes + x_bytes + b_bytes + m_bytes + o_bytes + tmp_bytes + (2 << 20)


def _pick_config(E, V, out_itemsize):
    cap = _vmem_capacity_bytes()
    budget = int(cap * 0.88)          # leave headroom for compiler scratch
    kind = _device_kind()

    # Single-buffer the (E, V) weight slab on v7x (64 MiB VMEM) or whenever a
    # double-buffered slab would eat more than half the budget: its block
    # index is constant across the inner row sweep, so double buffering only
    # costs VMEM (one exposed weight DMA per fertility slot, amortized).
    w_buffers = 2
    if ("v7" in kind) or (2 * E * V * 2 > budget // 2):
        w_buffers = 1

    # tile_m: 256 feeds the 2x256x256 MXU on v6e/v7x; keep 128 on v5e
    # (4x128x128 MXU) and whenever 256 does not fit in VMEM.
    tile_m = 128
    if ("v5" not in kind) and _vmem_need_bytes(256, E, V, w_buffers, out_itemsize) <= budget:
        tile_m = 256

    need = _vmem_need_bytes(tile_m, E, V, w_buffers, out_itemsize)
    vmem_limit = int(min(budget, max(32 << 20, need)))
    return tile_m, w_buffers, vmem_limit


def prepare_translation_params(weight, bias):
    """Cast projection params once at parameter-load time (bf16 weights for
    the MXU, f32 broadcast-row bias).  Avoids streaming Fp1*E*V*6 bytes of
    casts through HBM on every forward call."""
    Fp1, _, V = weight.shape
    return weight.astype(jnp.bfloat16), bias.reshape(Fp1, 1, V).astype(jnp.float32)


def translation_model_forward(embedded_input, input_mask, weight, bias, *,
                              tile_m=None, out_dtype=jnp.float32):
    """
    embedded_input: (B, S, E) float32
    input_mask    : (B, S)    float32/int (0/1)
    weight        : (F+1, E, V) float32 or bfloat16 (pre-cast preferred)
    bias          : (F+1, V) or (F+1, 1, V) float32
    returns       : (B, S, F+1, V) out_dtype log-probs (masked rows are 0)
    """
    B, S, E = embedded_input.shape
    Fp1, E_w, V = weight.shape[0], weight.shape[1], weight.shape[-1]
    assert E == E_w
    assert V % 128 == 0, "vocab_size should be a multiple of 128 for lane density"

    out_itemsize = jnp.dtype(out_dtype).itemsize
    auto_tile_m, w_buffers, vmem_limit = _pick_config(E, V, out_itemsize)
    if tile_m is None:
        tile_m = auto_tile_m
    assert tile_m % 8 == 0, "tile_m must be a multiple of 8 (sublane)"

    M = B * S
    n_row_tiles = pl.cdiv(M, tile_m)
    M_pad = n_row_tiles * tile_m

    x2d = embedded_input.reshape(M, E)
    mask2d = input_mask.reshape(M, 1).astype(jnp.float32)
    if M_pad != M:
        x2d = jnp.pad(x2d, ((0, M_pad - M), (0, 0)))
        mask2d = jnp.pad(mask2d, ((0, M_pad - M), (0, 0)))

    # bf16 operands for the MXU; accumulation / softmax stay f32.
    x2d = x2d.astype(jnp.bfloat16)
    # No-ops when params were pre-cast via prepare_translation_params().
    w_bf16 = weight if weight.dtype == jnp.bfloat16 else weight.astype(jnp.bfloat16)
    if bias.ndim == 2:
        bias = bias.reshape(Fp1, 1, V)
    bias3d = bias if bias.dtype == jnp.float32 else bias.astype(jnp.float32)

    # Per-row-tile "has any valid token" flag (scalar-prefetched into SMEM).
    tile_valid = (mask2d.reshape(n_row_tiles, tile_m) > 0).any(axis=1).astype(jnp.int32)

    w_spec_kwargs = {}
    if w_buffers == 1:
        w_spec_kwargs = dict(pipeline_mode=pl.Buffered(1))
    # weights: one (E, V) slab per fertility slot; constant over the inner row sweep
    w_spec = pl.BlockSpec((None, E, V), lambda f, i, valid: (f, 0, 0), **w_spec_kwargs)

    grid = (Fp1, n_row_tiles)  # fertility OUTER (weight slab stays resident), rows INNER

    out = pl.pallas_call(
        _translation_kernel,
        # Output emitted directly in final layout: (M, Fp1*V); no wrapper transpose.
        out_shape=jax.ShapeDtypeStruct((M_pad, Fp1 * V), out_dtype),
        grid_spec=pltpu.PrefetchScalarGridSpec(
            num_scalar_prefetch=1,
            grid=grid,
            in_specs=[
                # embeddings: tile over rows, full E
                pl.BlockSpec((tile_m, E), lambda f, i, valid: (i, 0)),
                w_spec,
                # bias: one (1, V) row per fertility slot
                pl.BlockSpec((None, 1, V), lambda f, i, valid: (f, 0, 0)),
                # mask: tile over rows
                pl.BlockSpec((tile_m, 1), lambda f, i, valid: (i, 0)),
            ],
            # lane-dense (tile_m, V) block at (row_tile, fertility)
            out_specs=pl.BlockSpec((tile_m, V), lambda f, i, valid: (i, f)),
        ),
        compiler_params=pltpu.CompilerParams(
            # steer megacore sharding onto the (large) row axis, not Fp1
            dimension_semantics=("arbitrary", "parallel"),
            vmem_limit_bytes=vmem_limit,
        ),
    )(tile_valid, x2d, w_bf16, bias3d, mask2d)

    return out[:M].reshape(B, S, Fp1, V)


def reference_forward(embedded_input, input_mask, weight, bias):
    # pure-JAX reference using the same bf16 operand precision (f32 accumulate).
    x = embedded_input.astype(jnp.bfloat16)
    w = weight.astype(jnp.bfloat16)
    logits = jnp.einsum("bse,fev->bsfv", x, w, preferred_element_type=jnp.float32)
    logits = logits + bias[None, None, :, :].astype(jnp.float32)
    log_probs = jax.nn.log_softmax(logits, axis=-1)
    return log_probs * input_mask[:, :, None, None].astype(jnp.float32)


if __name__ == "__main__":
    # small, deterministic shapes consistent with the module's forward contract
    B, S, E = 2, 8, 32           # batch, input_seq_len, embedding_dim
    MAX_FERTILITY = 3            # maximum_fertility
    Fp1 = MAX_FERTILITY + 1      # fertility slots (0..max)
    V = 256                      # vocab_size (target namespace)

    key = jax.random.PRNGKey(0)
    k_x, k_w, k_b, _ = jax.random.split(key, 4)

    embedded_input = jax.random.normal(k_x, (B, S, E), dtype=jnp.float32)
    # deterministic mask: last two positions of each sequence are padding
    input_mask = jnp.concatenate(
        [jnp.ones((B, S - 2), jnp.float32), jnp.zeros((B, 2), jnp.float32)], axis=1
    )
    weight = 0.1 * jax.random.normal(k_w, (Fp1, E, V), dtype=jnp.float32)
    bias = 0.01 * jax.random.normal(k_b, (Fp1, V), dtype=jnp.float32)

    # cast params once (hoisted out of the per-call path)
    w_bf16, bias3d = prepare_translation_params(weight, bias)

    out = translation_model_forward(embedded_input, input_mask, w_bf16, bias3d)
    out = jax.block_until_ready(out)

    ref = reference_forward(embedded_input, input_mask, weight, bias)
    assert out.shape == (B, S, Fp1, V)
    assert jnp.allclose(out, ref, atol=1e-4, rtol=1e-4), "mismatch vs reference"

    print("KERNEL_OK")
</pallas_src>

<mosaic_0001>
module attributes {stable_mosaic.version = 11 : i64} {
  func.func @_translation_kernel(%arg0: i32, %arg1: i32, %arg2: memref<1xi32, #tpu.memory_space<smem>>, %arg3: memref<256x32xbf16, #tpu.memory_space<vmem>>, %arg4: memref<1x32x256xbf16, #tpu.memory_space<vmem>>, %arg5: memref<1x1x256xf32, #tpu.memory_space<vmem>>, %arg6: memref<256x1xf32, #tpu.memory_space<vmem>>, %arg7: memref<256x256xf32, #tpu.memory_space<vmem>>) attributes {dimension_semantics = [#tpu.dimension_semantics<arbitrary>, #tpu.dimension_semantics<parallel>], iteration_bounds = array<i64: 4, 1>, scalar_prefetch = 1 : i64, scratch_operands = 0 : i64, tpu.core_type = #tpu.core_type<tc>, window_params = [{transform_indices = @transform_0, window_bounds = array<i64: 256, 32>}, {transform_indices = @transform_1, window_bounds = array<i64: 1, 32, 256>}, {transform_indices = @transform_2, window_bounds = array<i64: 1, 1, 256>}, {transform_indices = @transform_3, window_bounds = array<i64: 256, 1>}, {transform_indices = @transform_4, window_bounds = array<i64: 256, 256>}]} {
    %0 = arith.index_cast %arg1 : i32 to index
    %1 = memref.load %arg2[%0] : memref<1xi32, #tpu.memory_space<smem>>
    %c0_i32 = arith.constant 0 : i32
    %2 = arith.cmpi sgt, %1, %c0_i32 : i32
    %3 = arith.extui %2 : i1 to i32
    %c0_i32_0 = arith.constant 0 : i32
    %4 = arith.cmpi ne, %3, %c0_i32_0 : i32
    scf.if %4 {
      %c0 = arith.constant 0 : index
      %c0_3 = arith.constant 0 : index
      %10 = vector.load %arg3[%c0, %c0_3] : memref<256x32xbf16, #tpu.memory_space<vmem>>, vector<256x32xbf16>
      %c0_4 = arith.constant 0 : index
      %c0_5 = arith.constant 0 : index
      %c0_6 = arith.constant 0 : index
      %11 = vector.load %arg4[%c0_4, %c0_5, %c0_6] : memref<1x32x256xbf16, #tpu.memory_space<vmem>>, vector<1x32x256xbf16>
      %12 = vector.shape_cast %11 : vector<1x32x256xbf16> to vector<32x256xbf16>
      %cst = arith.constant dense<0.000000e+00> : vector<256x256xf32>
      %13 = tpu.matmul %10, %12, %cst {dimension_numbers = #tpu.dot_dimension_numbers<[1], [0], [0], [1], [0, 0, 1, 1], [], []>} : vector<256x32xbf16>, vector<32x256xbf16>, vector<256x256xf32> -> vector<256x256xf32>
      %c0_7 = arith.constant 0 : index
      %c0_8 = arith.constant 0 : index
      %c0_9 = arith.constant 0 : index
      %14 = vector.load %arg5[%c0_7, %c0_8, %c0_9] : memref<1x1x256xf32, #tpu.memory_space<vmem>>, vector<1x1x256xf32>
      %15 = vector.shape_cast %14 : vector<1x1x256xf32> to vector<1x256xf32>
      %16 = vector.broadcast %15 : vector<1x256xf32> to vector<256x256xf32>
      %17 = arith.addf %13, %16 : vector<256x256xf32>
      %c0_10 = arith.constant 0 : index
      %c0_11 = arith.constant 0 : index
      %18 = vector.load %arg7[%c0_10, %c0_11] : memref<256x256xf32, #tpu.memory_space<vmem>>, vector<256x256xf32>
      tpu.vector_store %arg7[%c0_10, %c0_11], %17 {strides = array<i32>} : memref<256x256xf32, #tpu.memory_space<vmem>>, vector<256x256xf32>,
      %c0_12 = arith.constant 0 : index
      %c0_13 = arith.constant 0 : index
      %19 = vector.load %arg7[%c0_12, %c0_13] : memref<256x256xf32, #tpu.memory_space<vmem>>, vector<256x256xf32>
      %cst_14 = arith.constant dense<0xFF800000> : vector<256xf32>
      %20 = vector.multi_reduction <maximumf>, %19, %cst_14 [1] : vector<256x256xf32> to vector<256xf32>
      %21 = vector.shape_cast %20 : vector<256xf32> to vector<256x1xf32>
      %22 = vector.broadcast %21 : vector<256x1xf32> to vector<256x256xf32>
      %23 = arith.subf %19, %22 : vector<256x256xf32>
      %24 = math.exp %23 : vector<256x256xf32>
      %cst_15 = arith.constant dense<0.000000e+00> : vector<256xf32>
      %25 = vector.multi_reduction <add>, %24, %cst_15 [1] : vector<256x256xf32> to vector<256xf32>
      %26 = vector.shape_cast %25 : vector<256xf32> to vector<256x1xf32>
      %27 = math.log %26 : vector<256x1xf32>
      %28 = vector.broadcast %27 : vector<256x1xf32> to vector<256x256xf32>
      %29 = arith.subf %23, %28 : vector<256x256xf32>
      %c0_16 = arith.constant 0 : index
      %c0_17 = arith.constant 0 : index
      %30 = vector.load %arg6[%c0_16, %c0_17] : memref<256x1xf32, #tpu.memory_space<vmem>>, vector<256x1xf32>
      %31 = vector.broadcast %30 : vector<256x1xf32> to vector<256x256xf32>
      %32 = arith.mulf %29, %31 : vector<256x256xf32>
      %c0_18 = arith.constant 0 : index
      %c0_19 = arith.constant 0 : index
      %33 = vector.load %arg7[%c0_18, %c0_19] : memref<256x256xf32, #tpu.memory_space<vmem>>, vector<256x256xf32>
      tpu.vector_store %arg7[%c0_18, %c0_19], %32 {strides = array<i32>} : memref<256x256xf32, #tpu.memory_space<vmem>>, vector<256x256xf32>,
    } else {
    }
    %5 = arith.index_cast %arg1 : i32 to index
    %6 = memref.load %arg2[%5] : memref<1xi32, #tpu.memory_space<smem>>
    %c0_i32_1 = arith.constant 0 : i32
    %7 = arith.cmpi eq, %6, %c0_i32_1 : i32
    %8 = arith.extui %7 : i1 to i32
    %c0_i32_2 = arith.constant 0 : i32
    %9 = arith.cmpi ne, %8, %c0_i32_2 : i32
    scf.if %9 {
      %cst = arith.constant 0.000000e+00 : f32
      %10 = vector.broadcast %cst : f32 to vector<256x256xf32>
      %c0 = arith.constant 0 : index
      %c0_3 = arith.constant 0 : index
      %11 = vector.load %arg7[%c0, %c0_3] : memref<256x256xf32, #tpu.memory_space<vmem>>, vector<256x256xf32>
      tpu.vector_store %arg7[%c0, %c0_3], %10 {strides = array<i32>} : memref<256x256xf32, #tpu.memory_space<vmem>>, vector<256x256xf32>,
    } else {
    }
    return
  }
  func.func @transform_0(%arg0: i32, %arg1: i32, %arg2: memref<1xi32, #tpu.memory_space<smem>>) -> (i32, i32) {
    %c0_i32 = arith.constant 0 : i32
    %c0_i32_0 = arith.constant 0 : i32
    return %arg1, %c0_i32 : i32, i32
  }
  func.func @transform_1(%arg0: i32, %arg1: i32, %arg2: memref<1xi32, #tpu.memory_space<smem>>) -> (i32, i32, i32) {
    %c0_i32 = arith.constant 0 : i32
    %c0_i32_0 = arith.constant 0 : i32
    %c0_i32_1 = arith.constant 0 : i32
    return %arg0, %c0_i32, %c0_i32_0 : i32, i32, i32
  }
  func.func @transform_2(%arg0: i32, %arg1: i32, %arg2: memref<1xi32, #tpu.memory_space<smem>>) -> (i32, i32, i32) {
    %c0_i32 = arith.constant 0 : i32
    %c0_i32_0 = arith.constant 0 : i32
    %c0_i32_1 = arith.constant 0 : i32
    return %arg0, %c0_i32, %c0_i32_0 : i32, i32, i32
  }
  func.func @transform_3(%arg0: i32, %arg1: i32, %arg2: memref<1xi32, #tpu.memory_space<smem>>) -> (i32, i32) {
    %c0_i32 = arith.constant 0 : i32
    %c0_i32_0 = arith.constant 0 : i32
    return %arg1, %c0_i32 : i32, i32
  }
  func.func @transform_4(%arg0: i32, %arg1: i32, %arg2: memref<1xi32, #tpu.memory_space<smem>>) -> (i32, i32) {
    %c0_i32 = arith.constant 0 : i32
    return %arg1, %arg0 : i32, i32
  }
}

</mosaic_0001>

<bundles_post_ra>
// kernel: tpu_custom_call.1
= control target key start
LH: loop header
LB: loop body
LE: loop exit
PB: predicated region body
PF: predicated region fallthrough
CT: control target
= control target key end

     0   :  { %s3485_s0 = inlined_call_operand.<no memory space> [shape: s32[1], index: 0, kind: input, shape index: {}]   ;;  %s3486_s1 = inlined_call_operand.vmem [shape: bf16[256,32], index: 1, kind: input, shape index: {}]   ;;  %s3487_s2 = inlined_call_operand.vmem [shape: bf16[4,32,256], index: 2, kind: input, shape index: {}]   ;;  %s3488_s3 = inlined_call_operand.vmem [shape: f32[4,1,256], index: 3, kind: input, shape index: {}]   ;;  %s3489_s4 = inlined_call_operand.vmem [shape: f32[256,1], index: 4, kind: input, shape index: {}]   ;;  %s3490_s5 = inlined_call_operand.hbm [shape: f32[256,1024], index: 5, kind: output, shape index: {}]  }
   0x1   :  { %10 = sst [smem:[#allocation3]] %s3485_s0 }
   0x2   :  { %11 = vsyncpa [#allocation5], 0 }
   0x3   :  { %13 = vsyncpa [#allocation5 + $0x1], 0  ;;  %s2285_s20 = smov 0   ;;  %s2287_s21 = smov 0  }
   0x4   :  { %s2289_s22 = smov 0   ;;  %s2291_s23 = smov 0  }
   0x5   :  { %s2293_s24 = smov 0   ;;  %s2295_s25 = smov 0  }
   0x6 LB: > { %s1832_s0 = sadd.s32 4294967295, %s2244_s25   ;;  %s1833_s26 = sadd.s32 4294967294, %s2244_s25   ;;  %s2244_s25 = sphi %s2295_s25, %s19_s25   ;;  %s2240_s24 = sphi %s2293_s24, %s3680_s24   ;;  %s2236_s23 = sphi %s2291_s23, %s3679_s23   ;;  %s2232_s22 = sphi %s2289_s22, %s3678_s22   ;;  %s2228_s21 = sphi %s2287_s21, %s3677_s21   ;;  %s2224_s20 = sphi %s2285_s20, %s3676_s20  }
   0x7   : > { %s31_s27 = sadd.s32 1, %s2240_s24  ;;  %s144_s28 = sadd.s32 1, %s2232_s22 }
   0x8   : > { %p33_p0 = scmp.ge.s32.totalorder %s31_s27, 4  ;;  %p154_p1 = scmp.ne.s32.totalorder %s2232_s22, %s2228_s21 }
   0x9   : > { %p155_p2 = scmp.eq.s32.totalorder %s1832_s0, 3  ;;  %p160_p3 = scmp.ne.s32.totalorder %s2228_s21, %s2224_s20 }
   0xa   : > { %s3682_s27 = smov (%p33_p0, %s31_s27), 0  ;;  %p161_p5 = scmp.eq.s32.totalorder %s1833_s26, 3 }
   0xb   : > { %p2325_p4 = por %p155_p2, %p154_p1  ;;  %s140_s30 = ssub.s32 %s2240_s24, %s3682_s27 }
   0xc   : > { %p1838_p6 = scmp.ge.s32.totalorder %s2244_s25, 1  ;;  %p142_p7 = scmp.eq.s32.totalorder %s140_s30, 0 }
   0xd   : > { %p2332_p8 = por %p161_p5, %p160_p3  ;;  %p212_p9 = scmp.lt.s32.totalorder %s2244_s25, 5 }
   0xe   : > { %s2338_s7 = scalar_select %p142_p7, %s2232_s22, %s144_s28  }
   0xf   : > { %p213_p10 = pnand %p1838_p6, %p212_p9 }
  0x10   : > { %s249_s8 = sand.u32 (!%p213_p10), 1, %s2228_s21   ;;  %p258_p11 = scmp.lt.s32.totalorder (!%p213_p10), %s2236_s23, 3 }
  0x11   : > { %216 = sbr.rel (%p213_p10) target bundleno = 701 (0x2bd), region = 36  ;;  %s1839_s9 = sshll.u32 (!%p213_p10), %s249_s8, 9 }
  0x12   : > { %s276_s10 = sld [smem:[#allocation3]] (!%p213_p10)  ;;  %s2353_s0 = scalar_lea.vmem (!%p213_p10), [#allocation4], %s1839_s9 }
  0x16   : > { %s259_s11 = scalar_select %p258_p11, %s2236_s23, 3 }
  0x18   : > { %s1886_s12 = sshll.u32 %s259_s11, 5  ;;  %s1842_s13 = sshll.u32 %s259_s11, 1 }
  0x19   : > { %s262_s16 = scalar_lea.vmem %s3487_s2, %s1886_s12  ;;  %s2351_s19 = scalar_lea.vmem %s3488_s3, %s1842_s13 }
  0x1a   : > { %p1843_p12 = scmp.le.s32.totalorder %s276_s10, 0 }
  0x1c   : > { %280 = sbr.rel (%p1843_p12) target bundleno = 630 (0x276), region = 40 }
  0x21   : > { %v1954_v0 = vld [vmem:[%s262_s16 + $0x14] ss:$8 sps:$4 sm:$0xff]   ;;  %v1956_v1 = vld [vmem:[%s262_s16 + $0x10] ss:$8 sps:$4 sm:$0xff]   ;;  %v2246_v2 = vmov 0   ;;  %v1960_v5 = vld [vmem:[%s3486_s1] sm:$0xff]   ;;  %v319_v49 = vlaneseq }
  0x22   : > { %510 = vmatprep.mubr.bf16.mxu0 %v2246_v2  ;;  %590 = vmatprep.mubr.bf16.mxu1 %v2246_v2  ;;  %v1957_v3 = vld [vmem:[%s262_s16 + $0x4] ss:$8 sps:$4 sm:$0xff]   ;;  %v1959_v4 = vld [vmem:[%s262_s16] ss:$8 sps:$4 sm:$0xff]   ;;  %vm429_vm0 = vcmask 261120   ;;  %v1313_v10 = vld [vmem:[%s3489_s4 + $0x10] sm:$0xff] }
  0x23   : > { %490 = vmatprep.subr.bf16.mxu0 %v1954_v0  ;;  %1888 = vmatprep.subr.bf16.mxu1 %v1954_v0  ;;  %v1961_v6 = vld [vmem:[%s3486_s1 + $0x40] sm:$0xff]   ;;  %v1962_v7 = vld [vmem:[%s3486_s1 + $0x8] sm:$0xff]   ;;  %v1964_v11 = vld [vmem:[%s3486_s1 + $0x10] sm:$0xff]   ;;  %v320_v50 = vshrl.u32 %v319_v49, 7 }
  0x24   : > { %491 = vmatpush1.bf16.msra.mxu0 %v1956_v1  ;;  %1890 = vmatpush1.bf16.msra.mxu1 %v1956_v1  ;;  %v1963_v8 = vld [vmem:[%s3486_s1 + $0x48] sm:$0xff]   ;;  %v1965_v12 = vld [vmem:[%s3486_s1 + $0x50] sm:$0xff]   ;;  %v1314_v13 = vld [vmem:[%s3489_s4 + $0x18] sm:$0xff] }
  0x25   : > { %492 = vmatprep.subr.bf16.mxu0 %v1957_v3  ;;  %1889 = vmatprep.subr.bf16.mxu1 %v1957_v3  ;;  %v1312_v9 = vld [vmem:[%s3489_s4 + $0x8] sm:$0xff]  ;;  %v1311_v14 = vld [vmem:[%s3489_s4] sm:$0xff]  ;;  %v1322_v17 = vld [vmem:[%s3489_s4 + $0x58] sm:$0xff]  ;;  %v321_v51 = vsub.s32 0, %v320_v50  ;;  %v325_v52 = vsub.s32 1, %v320_v50 }
  0x26   : > { %1953 = vset.pattern.permute.xlu1 %v2246_v2  ;;  %1952 = vset.pattern.permute.xlu0 %v2246_v2  ;;  %v1320_v15 = vld [vmem:[%s3489_s4 + $0x48] sm:$0xff]  ;;  %v1315_v16 = vld [vmem:[%s3489_s4 + $0x20] sm:$0xff]  ;;  %v1966_v18 = vld [vmem:[%s3486_s1 + $0x18] sm:$0xff]  }
  0x27   : > { %1350 = vperm.xlu1 %1953, %v1312_v9   ;;  %1345 = vperm.xlu0 %1952, %v1311_v14   ;;  %v1967_v19 = vld [vmem:[%s3486_s1 + $0x58] sm:$0xff]   ;;  %v1316_v20 = vld [vmem:[%s3489_s4 + $0x28] sm:$0xff]  ;;  %v1317_v22 = vld [vmem:[%s3489_s4 + $0x30] sm:$0xff] }
  0x28   : > { %493 = vmatpush1.bf16.msra.mxu0 %v1959_v4  ;;  %1891 = vmatpush1.bf16.msra.mxu1 %v1959_v4  ;;  %v1324_v21 = vld [vmem:[%s3489_s4 + $0x68] sm:$0xff]  ;;  %v1326_v23 = vld [vmem:[%s3489_s4 + $0x78] sm:$0xff]  ;;  %v1968_v24 = vld [vmem:[%s3486_s1 + $0x20] sm:$0xff]  }
  0x29   : > { %v1969_v25 = vld [vmem:[%s3486_s1 + $0x60] sm:$0xff]   ;;  %v1318_v26 = vld [vmem:[%s3489_s4 + $0x38] sm:$0xff]  ;;  %v1328_v27 = vld [vmem:[%s3489_s4 + $0x88] sm:$0xff] }
  0x2a   : > { %v1319_v28 = vld [vmem:[%s3489_s4 + $0x40] sm:$0xff]  ;;  %v1330_v29 = vld [vmem:[%s3489_s4 + $0x98] sm:$0xff]  ;;  %v1970_v30 = vld [vmem:[%s3486_s1 + $0x28] sm:$0xff]  }
  0x2b   : > { %1864 = vmatmul.mubr.msk.bf16.vlgmr.msra.gmra.mxu0 %vm429_vm0, %v1960_v5  ;;  %1872 = vmatmul.mubr.msk.bf16.vlgmr.msra.gmra.mxu1 %vm429_vm0, %v1961_v6  ;;  %v1971_v31 = vld [vmem:[%s3486_s1 + $0x68] sm:$0xff]   ;;  %v1321_v32 = vld [vmem:[%s3489_s4 + $0x50] sm:$0xff]  ;;  %v1323_v34 = vld [vmem:[%s3489_s4 + $0x60] sm:$0xff] }
  0x2c   : > { %520 = vmatprep.mubr.bf16.mxu0 %v2246_v2  ;;  %600 = vmatprep.mubr.bf16.mxu1 %v2246_v2  ;;  %v1332_v33 = vld [vmem:[%s3489_s4 + $0xa8] sm:$0xff]  ;;  %v1334_v35 = vld [vmem:[%s3489_s4 + $0xb8] sm:$0xff]  ;;  %v1972_v36 = vld [vmem:[%s3486_s1 + $0x30] sm:$0xff]  }
  0x2d   : > { %1355 = vperm.xlu1 %1953, %v1313_v10   ;;  %1390 = vperm.xlu0 %1952, %v1320_v15   ;;  %v1973_v37 = vld [vmem:[%s3486_s1 + $0x70] sm:$0xff]   ;;  %v1336_v39 = vld [vmem:[%s3489_s4 + $0xc8] sm:$0xff]  ;;  %v1327_v40 = vld [vmem:[%s3489_s4 + $0x80] sm:$0xff] }
  0x2e   : > { %v1325_v38 = vld [vmem:[%s3489_s4 + $0x70] sm:$0xff]  ;;  %v1338_v41 = vld [vmem:[%s3489_s4 + $0xd8] sm:$0xff]  ;;  %v1331_v45 = vld [vmem:[%s3489_s4 + $0xa0] sm:$0xff] }
  0x2f   : > { %v1974_v42 = vld [vmem:[%s3486_s1 + $0x38] sm:$0xff]   ;;  %v1329_v44 = vld [vmem:[%s3489_s4 + $0x90] sm:$0xff]  ;;  %v1335_v47 = vld [vmem:[%s3489_s4 + $0xc0] sm:$0xff] }
  0x30   : > { %v1975_v43 = vld [vmem:[%s3486_s1 + $0x78] sm:$0xff]   ;;  %v1333_v46 = vld [vmem:[%s3489_s4 + $0xb0] sm:$0xff]  ;;  %v317_v53 = vld [vmem:[%s2351_s19] sm:$0x3] }
  0x31   : > { %1360 = vperm.xlu1 %1953, %v1314_v13   ;;  %1400 = vperm.xlu0 %1952, %v1322_v17   ;;  %v1337_v48 = vld [vmem:[%s3489_s4 + $0xd0] sm:$0xff]  ;;  %v2522_v54 = vrot.slane %v317_v53, %v321_v51  ;;  %v2524_v55 = vrot.slane %v317_v53, %v325_v52 }
  0x33   : > { %1865 = vmatmul.mubr.msk.bf16.gmra.mxu0 %vm429_vm0, %v1962_v7  ;;  %1873 = vmatmul.mubr.msk.bf16.gmra.mxu1 %vm429_vm0, %v1963_v8 }
  0x34   : > { %530 = vmatprep.mubr.bf16.mxu0 %v2246_v2  ;;  %610 = vmatprep.mubr.bf16.mxu1 %v2246_v2 }
  0x35   : > { %1365 = vperm.xlu1 %1953, %v1315_v16   ;;  %1410 = vperm.xlu0 %1952, %v1324_v21  }
  0x39   : > { %1370 = vperm.xlu1 %1953, %v1316_v20   ;;  %1420 = vperm.xlu0 %1952, %v1326_v23  }
  0x3b   : > { %1866 = vmatmul.mubr.msk.bf16.gmra.mxu0 %vm429_vm0, %v1964_v11  ;;  %1874 = vmatmul.mubr.msk.bf16.gmra.mxu1 %vm429_vm0, %v1965_v12 }
  0x3c   : > { %540 = vmatprep.mubr.bf16.mxu0 %v2246_v2  ;;  %620 = vmatprep.mubr.bf16.mxu1 %v2246_v2 }
  0x3d   : > { %1375 = vperm.xlu1 %1953, %v1317_v22   ;;  %1430 = vperm.xlu0 %1952, %v1328_v27  }
  0x41   : > { %1380 = vperm.xlu1 %1953, %v1318_v26   ;;  %1440 = vperm.xlu0 %1952, %v1330_v29  }
  0x43   : > { %1867 = vmatmul.mubr.msk.bf16.gmra.mxu0 %vm429_vm0, %v1966_v18  ;;  %1875 = vmatmul.mubr.msk.bf16.gmra.mxu1 %vm429_vm0, %v1967_v19 }
  0x44   : > { %550 = vmatprep.mubr.bf16.mxu0 %v2246_v2  ;;  %630 = vmatprep.mubr.bf16.mxu1 %v2246_v2 }
  0x45   : > { %1385 = vperm.xlu1 %1953, %v1319_v28   ;;  %1450 = vperm.xlu0 %1952, %v1332_v33  }
  0x49   : > { %1395 = vperm.xlu1 %1953, %v1321_v32   ;;  %1460 = vperm.xlu0 %1952, %v1334_v35  }
  0x4b   : > { %1868 = vmatmul.mubr.msk.bf16.gmra.mxu0 %vm429_vm0, %v1968_v24  ;;  %1876 = vmatmul.mubr.msk.bf16.gmra.mxu1 %vm429_vm0, %v1969_v25 }
  0x4c   : > { %560 = vmatprep.mubr.bf16.mxu0 %v2246_v2  ;;  %640 = vmatprep.mubr.bf16.mxu1 %v2246_v2 }
  0x4d   : > { %1405 = vperm.xlu1 %1953, %v1323_v34   ;;  %1470 = vperm.xlu0 %1952, %v1336_v39  }
  0x51   : > { %1415 = vperm.xlu1 %1953, %v1325_v38   ;;  %1480 = vperm.xlu0 %1952, %v1338_v41  }
  0x53   : > { %1869 = vmatmul.mubr.msk.bf16.gmra.mxu0 %vm429_vm0, %v1970_v30  ;;  %1877 = vmatmul.mubr.msk.bf16.gmra.mxu1 %vm429_vm0, %v1971_v31 }
  0x54   : > { %570 = vmatprep.mubr.bf16.mxu0 %v2246_v2  ;;  %650 = vmatprep.mubr.bf16.mxu1 %v2246_v2 }
  0x55   : > { %1425 = vperm.xlu1 %1953, %v1327_v40  }
  0x59   : > { %1435 = vperm.xlu1 %1953, %v1329_v44  }
  0x5b   : > { %1870 = vmatmul.mubr.msk.bf16.gmra.mxu0 %vm429_vm0, %v1972_v36  ;;  %1878 = vmatmul.mubr.msk.bf16.gmra.mxu1 %vm429_vm0, %v1973_v37 }
  0x5c   : > { %580 = vmatprep.mubr.bf16.mxu0 %v2246_v2  ;;  %660 = vmatprep.mubr.bf16.mxu1 %v2246_v2 }
  0x5d   : > { %1445 = vperm.xlu1 %1953, %v1331_v45  }
  0x61   : > { %1455 = vperm.xlu1 %1953, %v1333_v46  }
  0x63   : > { %1871 = vmatmul.mubr.msk.bf16.gmra.mxu0 %vm429_vm0, %v1974_v42  ;;  %1879 = vmatmul.mubr.msk.bf16.gmra.mxu1 %vm429_vm0, %v1975_v43 }
  0x65   : > { %1465 = vperm.xlu1 %1953, %v1335_v47  }
  0x69   : > { %1475 = vperm.xlu1 %1953, %v1337_v48  }
  0xeb   : > { %v512_v56 = vpop.f32.mrf.mxu0  ;;  %v592_v57 = vpop.f32.mrf.mxu1 }
  0xec   : > { %v2527_v60 = vadd.f32 %v512_v56, %v2522_v54  ;;  %v2533_v0 = vadd.f32 %v592_v57, %v2522_v54 }
  0xed   : > { %v514_v58 = vpop.f32.mrf.mxu0  ;;  %v594_v59 = vpop.f32.mrf.mxu1 }
  0xee   : > { %v2530_v61 = vadd.f32 %v514_v58, %v2524_v55  ;;  %v2536_v1 = vadd.f32 %v594_v59, %v2524_v55 }
  0xef   : > { %v516_v62 = vpop.f32.mrf.mxu0  ;;  %v596_v63 = vpop.f32.mrf.mxu1 }
  0xf0   : > { %v799_v2 = vmax.f32 %v2527_v60, %v2530_v61  ;;  %v2541_v5 = vadd.f32 %v596_v63, %v2522_v54  ;;  %v847_v12 = vmax.f32 %v2533_v0, %v2536_v1  ;;  %v2557_v13 = vadd.f32 %v516_v62, %v2522_v54 }
  0xf1   : > { %v518_v3 = vpop.f32.mrf.mxu0  ;;  %v598_v4 = vpop.f32.mrf.mxu1 }
  0xf2   : > { %v2544_v6 = vadd.f32 %v598_v4, %v2524_v55  ;;  %800 = vmax.xlane.f32.xlu0 %v799_v2  ;;  %v2547_v9 = vadd.f32 %v518_v3, %v2524_v55 }
  0xf3   : > { %v522_v7 = vpop.f32.mrf.mxu0  ;;  %v602_v8 = vpop.f32.mrf.mxu1 }
  0xf4   : > { %v2550_v10 = vadd.f32 %v522_v7, %v2522_v54  ;;  %v850_v11 = vmax.f32 %v2541_v5, %v2544_v6  ;;  %v2563_v17 = vadd.f32 %v602_v8, %v2522_v54  ;;  %v802_v22 = vmax.f32 %v2557_v13, %v2547_v9 }
  0xf5   : > { %v524_v14 = vpop.f32.mrf.mxu0  ;;  %v604_v15 = vpop.f32.mrf.mxu1 }
  0xf6   : > { %v2560_v16 = vadd.f32 %v524_v14, %v2524_v55  ;;  %v2566_v18 = vadd.f32 %v604_v15, %v2524_v55  ;;  %851 = vmax.xlane.f32.xlu1 %v850_v11  ;;  %848 = vmax.xlane.f32.xlu0 %v847_v12 }
  0xf7   : > { %v526_v19 = vpop.f32.mrf.mxu0  ;;  %v606_v20 = vpop.f32.mrf.mxu1 }
  0xf8   : > { %v805_v21 = vmax.f32 %v2550_v10, %v2560_v16  ;;  %v2573_v25 = vadd.f32 %v526_v19, %v2522_v54  ;;  %v853_v27 = vmax.f32 %v2563_v17, %v2566_v18  ;;  %v2581_v30 = vadd.f32 %v606_v20, %v2522_v54 }
  0xf9   : > { %v528_v23 = vpop.f32.mrf.mxu0  ;;  %v608_v24 = vpop.f32.mrf.mxu1 }
  0xfa   : > { %v2576_v26 = vadd.f32 %v528_v23, %v2524_v55  ;;  %806 = vmax.xlane.f32.xlu1 %v805_v21  ;;  %803 = vmax.xlane.f32.xlu0 %v802_v22  ;;  %v2587_v32 = vadd.f32 %v608_v24, %v2524_v55 }
  0xfb   : > { %v532_v28 = vpop.f32.mrf.mxu0  ;;  %v612_v29 = vpop.f32.mrf.mxu1 }
  0xfc   : > { %v2584_v31 = vadd.f32 %v532_v28, %v2522_v54  ;;  %v808_v33 = vmax.f32 %v2573_v25, %v2576_v26  ;;  %v2595_v37 = vadd.f32 %v612_v29, %v2522_v54  ;;  %v856_v41 = vmax.f32 %v2581_v30, %v2587_v32 }
  0xfd   : > { %v534_v34 = vpop.f32.mrf.mxu0  ;;  %v614_v35 = vpop.f32.mrf.mxu1 }
  0xfe   : > { %v2592_v36 = vadd.f32 %v534_v34, %v2524_v55  ;;  %v2598_v38 = vadd.f32 %v614_v35, %v2524_v55  ;;  %809 = vmax.xlane.f32.xlu1 %v808_v33  ;;  %854 = vmax.xlane.f32.xlu0 %v853_v27 }
  0xff   : > { %v536_v39 = vpop.f32.mrf.mxu0  ;;  %v616_v40 = vpop.f32.mrf.mxu1 }
 0x100   : > { %v811_v42 = vmax.f32 %v2584_v31, %v2592_v36  ;;  %v2605_v45 = vadd.f32 %v536_v39, %v2522_v54  ;;  %v859_v47 = vmax.f32 %v2595_v37, %v2598_v38  ;;  %v2613_v50 = vadd.f32 %v616_v40, %v2522_v54 }
 0x101   : > { %v538_v43 = vpop.f32.mrf.mxu0  ;;  %v618_v44 = vpop.f32.mrf.mxu1 }
 0x102   : > { %v2608_v46 = vadd.f32 %v538_v43, %v2524_v55  ;;  %857 = vmax.xlane.f32.xlu1 %v856_v41  ;;  %812 = vmax.xlane.f32.xlu0 %v811_v42  ;;  %v2619_v52 = vadd.f32 %v618_v44, %v2524_v55 }
 0x103   : > { %v542_v48 = vpop.f32.mrf.mxu0  ;;  %v622_v49 = vpop.f32.mrf.mxu1 }
 0x104   : > { %v2616_v51 = vadd.f32 %v542_v48, %v2522_v54  ;;  %v814_v53 = vmax.f32 %v2605_v45, %v2608_v46  ;;  %v2627_v59 = vadd.f32 %v622_v49, %v2522_v54  ;;  %v862_v3 = vmax.f32 %v2613_v50, %v2619_v52 }
 0x105   : > { %v544_v56 = vpop.f32.mrf.mxu0  ;;  %v624_v57 = vpop.f32.mrf.mxu1 }
 0x106   : > { %v2624_v58 = vadd.f32 %v544_v56, %v2524_v55  ;;  %v2630_v62 = vadd.f32 %v624_v57, %v2524_v55  ;;  %815 = vmax.xlane.f32.xlu1 %v814_v53  ;;  %860 = vmax.xlane.f32.xlu0 %v859_v47 }
 0x107   : > { %v546_v63 = vpop.f32.mrf.mxu0  ;;  %v626_v2 = vpop.f32.mrf.mxu1 }
 0x108   : > { %v817_v4 = vmax.f32 %v2616_v51, %v2624_v58  ;;  %v2637_v11 = vadd.f32 %v546_v63, %v2522_v54  ;;  %v865_v14 = vmax.f32 %v2627_v59, %v2630_v62  ;;  %v2645_v20 = vadd.f32 %v626_v2, %v2522_v54 }
 0x109   : > { %v548_v7 = vpop.f32.mrf.mxu0  ;;  %v628_v8 = vpop.f32.mrf.mxu1 }
 0x10a   : > { %v2640_v12 = vadd.f32 %v548_v7, %v2524_v55  ;;  %863 = vmax.xlane.f32.xlu1 %v862_v3  ;;  %818 = vmax.xlane.f32.xlu0 %v817_v4  ;;  %v2651_v22 = vadd.f32 %v628_v8, %v2524_v55 }
 0x10b   : > { %v552_v15 = vpop.f32.mrf.mxu0  ;;  %v632_v19 = vpop.f32.mrf.mxu1 }
 0x10c   : > { %v2648_v21 = vadd.f32 %v552_v15, %v2522_v54  ;;  %v820_v23 = vmax.f32 %v2637_v11, %v2640_v12  ;;  %v2659_v29 = vadd.f32 %v632_v19, %v2522_v54  ;;  %v868_v39 = vmax.f32 %v2645_v20, %v2651_v22 }
 0x10d   : > { %v554_v24 = vpop.f32.mrf.mxu0  ;;  %v634_v27 = vpop.f32.mrf.mxu1 }
 0x10e   : > { %v2656_v28 = vadd.f32 %v554_v24, %v2524_v55  ;;  %v2662_v33 = vadd.f32 %v634_v27, %v2524_v55  ;;  %821 = vmax.xlane.f32.xlu1 %v820_v23  ;;  %866 = vmax.xlane.f32.xlu0 %v865_v14 }
 0x10f   : > { %v556_v34 = vpop.f32.mrf.mxu0  ;;  %v636_v35 = vpop.f32.mrf.mxu1 }
 0x110   : > { %v823_v40 = vmax.f32 %v2648_v21, %v2656_v28  ;;  %v2669_v43 = vadd.f32 %v556_v34, %v2522_v54  ;;  %v871_v47 = vmax.f32 %v2659_v29, %v2662_v33  ;;  %v2677_v53 = vadd.f32 %v636_v35, %v2522_v54  ;;  %v2700_v34 = vpop.permute.xlu1 %1350 }
 0x111   : > { %v558_v41 = vpop.f32.mrf.mxu0  ;;  %v638_v42 = vpop.f32.mrf.mxu1  ;;  %3555 = vst [vmem:[#allocation8_spill] sm:$0xff] %v2700_v34 }
 0x112   : > { %v2672_v44 = vadd.f32 %v558_v41, %v2524_v55  ;;  %869 = vmax.xlane.f32.xlu1 %v868_v39  ;;  %824 = vmax.xlane.f32.xlu0 %v823_v40  ;;  %v2683_v57 = vadd.f32 %v638_v42, %v2524_v55 }
 0x113   : > { %v562_v48 = vpop.f32.mrf.mxu0  ;;  %v642_v49 = vpop.f32.mrf.mxu1 }
 0x114   : > { %v2680_v56 = vadd.f32 %v562_v48, %v2522_v54  ;;  %v826_v63 = vmax.f32 %v2669_v43, %v2672_v44  ;;  %v2691_v7 = vadd.f32 %v642_v49, %v2522_v54  ;;  %v874_v19 = vmax.f32 %v2677_v53, %v2683_v57 }
 0x115   : > { %v564_v2 = vpop.f32.mrf.mxu0  ;;  %v644_v3 = vpop.f32.mrf.mxu1 }
 0x116   : > { %v2688_v4 = vadd.f32 %v564_v2, %v2524_v55  ;;  %v2694_v8 = vadd.f32 %v644_v3, %v2524_v55  ;;  %827 = vmax.xlane.f32.xlu1 %v826_v63  ;;  %872 = vmax.xlane.f32.xlu0 %v871_v47 }
 0x117   : > { %v566_v14 = vpop.f32.mrf.mxu0  ;;  %v646_v15 = vpop.f32.mrf.mxu1 }
 0x118   : > { %3554 = vst [vmem:[#allocation7_spill] sm:$0xff] %v2694_v8  ;;  %v829_v23 = vmax.f32 %v2680_v56, %v2688_v4  ;;  %v2703_v35 = vadd.f32 %v566_v14, %v2522_v54  ;;  %v877_v40 = vmax.f32 %v2691_v7, %v2694_v8  ;;  %v2711_v47 = vadd.f32 %v646_v15, %v2522_v54 }
 0x119   : > { %v568_v24 = vpop.f32.mrf.mxu0  ;;  %v648_v27 = vpop.f32.mrf.mxu1 }
 0x11a   : > { %v2706_v39 = vadd.f32 %v568_v24, %v2524_v55  ;;  %875 = vmax.xlane.f32.xlu1 %v874_v19  ;;  %830 = vmax.xlane.f32.xlu0 %v829_v23  ;;  %3556 = vst [vmem:[#allocation9_spill] sm:$0xff] %v2711_v47  ;;  %v2717_v49 = vadd.f32 %v648_v27, %v2524_v55  ;;  %v2730_v27 = vpop.permute.xlu1 %1355 }
 0x11b   : > { %v572_v41 = vpop.f32.mrf.mxu0  ;;  %v652_v42 = vpop.f32.mrf.mxu1  ;;  %3562 = vst [vmem:[#allocation15_spill] sm:$0xff] %v2730_v27 }
 0x11c   : > { %v2714_v48 = vadd.f32 %v572_v41, %v2522_v54  ;;  %3558 = vst [vmem:[#allocation11_spill] sm:$0xff] %v2717_v49  ;;  %v832_v63 = vmax.f32 %v2703_v35, %v2706_v39  ;;  %v2725_v19 = vadd.f32 %v652_v42, %v2522_v54  ;;  %v880_v41 = vmax.f32 %v2711_v47, %v2717_v49 }
 0x11d   : > { %v574_v2 = vpop.f32.mrf.mxu0  ;;  %v654_v3 = vpop.f32.mrf.mxu1 }
 0x11e   : > { %3557 = vst [vmem:[#allocation10_spill] sm:$0xff] %v2714_v48  ;;  %v2722_v14 = vadd.f32 %v574_v2, %v2524_v55  ;;  %3560 = vst [vmem:[#allocation13_spill] sm:$0xff] %v2725_v19  ;;  %v2728_v15 = vadd.f32 %v654_v3, %v2524_v55  ;;  %833 = vmax.xlane.f32.xlu1 %v832_v63  ;;  %878 = vmax.xlane.f32.xlu0 %v877_v40 }
 0x11f   : > { %v576_v23 = vpop.f32.mrf.mxu0  ;;  %v656_v24 = vpop.f32.mrf.mxu1 }
 0x120   : > { %3559 = vst [vmem:[#allocation12_spill] sm:$0xff] %v2722_v14  ;;  %3561 = vst [vmem:[#allocation14_spill] sm:$0xff] %v2728_v15  ;;  %v835_v34 = vmax.f32 %v2714_v48, %v2722_v14  ;;  %v2737_v42 = vadd.f32 %v576_v23, %v2522_v54  ;;  %v883_v40 = vmax.f32 %v2725_v19, %v2728_v15 }
 0x121   : > { %v578_v2 = vpop.f32.mrf.mxu0  ;;  %v658_v8 = vpop.f32.mrf.mxu1  ;;  %v2745_v49 = vadd.f32 %v656_v24, %v2522_v54 }
 0x122   : > { %3563 = vst [vmem:[#allocation16_spill] sm:$0xff] %v2737_v42  ;;  %v2740_v3 = vadd.f32 %v578_v2, %v2524_v55  ;;  %881 = vmax.xlane.f32.xlu1 %v880_v41  ;;  %836 = vmax.xlane.f32.xlu0 %v835_v34  ;;  %v2751_v48 = vadd.f32 %v658_v8, %v2524_v55  ;;  %v2755_v34 = vpop.permute.xlu1 %1360 }
 0x123   : > { %v582_v63 = vpop.f32.mrf.mxu0  ;;  %v662_v27 = vpop.f32.mrf.mxu1  ;;  %3566 = vst [vmem:[#allocation19_spill] sm:$0xff] %v2755_v34 }
 0x124   : > { %3564 = vst [vmem:[#allocation17_spill] sm:$0xff] %v2740_v3  ;;  %v2748_v14 = vadd.f32 %v582_v63, %v2522_v54  ;;  %3565 = vst [vmem:[#allocation18_spill] sm:$0xff] %v2751_v48  ;;  %v838_v23 = vmax.f32 %v2737_v42, %v2740_v3  ;;  %v2761_v19 = vadd.f32 %v662_v27, %v2522_v54 }
 0x125   : > { %v584_v2 = vpop.f32.mrf.mxu0  ;;  %v664_v41 = vpop.f32.mrf.mxu1  ;;  %v886_v3 = vmax.f32 %v2745_v49, %v2751_v48 }
 0x126   : > { %v2758_v15 = vadd.f32 %v584_v2, %v2524_v55  ;;  %v2764_v24 = vadd.f32 %v664_v41, %v2524_v55  ;;  %839 = vmax.xlane.f32.xlu1 %v838_v23  ;;  %884 = vmax.xlane.f32.xlu0 %v883_v40  ;;  %v2786_v48 = vpop.permute.xlu1 %1365 }
 0x127   : > { %v586_v8 = vpop.f32.mrf.mxu0  ;;  %v666_v63 = vpop.f32.mrf.mxu1  ;;  %3568 = vst [vmem:[#allocation21_spill] sm:$0xff] %v2786_v48 }
 0x128   : > { %3567 = vst [vmem:[#allocation20_spill] sm:$0xff] %v2758_v15  ;;  %v841_v42 = vmax.f32 %v2748_v14, %v2758_v15  ;;  %v2771_v2 = vadd.f32 %v586_v8, %v2522_v54  ;;  %v889_v40 = vmax.f32 %v2761_v19, %v2764_v24  ;;  %v2779_v23 = vadd.f32 %v666_v63, %v2522_v54  ;;  %v2794_v54 = vpop.permute.xlu0 %1345 }
 0x129   : > { %v588_v34 = vpop.f32.mrf.mxu0  ;;  %v668_v47 = vpop.f32.mrf.mxu1  ;;  %3571 = vst [vmem:[#allocation24_spill] sm:$0xff] %v2794_v54 }
 0x12a   : > { %v2774_v27 = vadd.f32 %v588_v34, %v2524_v55  ;;  %887 = vmax.xlane.f32.xlu1 %v886_v3  ;;  %842 = vmax.xlane.f32.xlu0 %v841_v42  ;;  %v2782_v41 = vadd.f32 %v668_v47, %v2524_v55  ;;  %v2790_v42 = vpop.permute.xlu1 %1370  ;;  %v1339_v55 = vld [vmem:[%s3489_s4 + $0xe0] sm:$0xff] }
 0x12b   : > { %3569 = vst [vmem:[#allocation22_spill] sm:$0xff] %v2790_v42 }
 0x12c   : > { %v844_v15 = vmax.f32 %v2771_v2, %v2774_v27  ;;  %v892_v3 = vmax.f32 %v2779_v23, %v2782_v41  ;;  %v2801_v47 = vpop.permute.xlu0 %1390 }
 0x12d   : > { %3573 = vst [vmem:[#allocation26_spill] sm:$0xff] %v2801_v47 }
 0x12e   : > { %845 = vmax.xlane.f32.xlu1 %v844_v15  ;;  %890 = vmax.xlane.f32.xlu0 %v889_v40  ;;  %v2792_v34 = vpop.permute.xlu1 %1375  ;;  %v1340_v15 = vld [vmem:[%s3489_s4 + $0xe8] sm:$0xff] }
 0x12f   : > { %3570 = vst [vmem:[#allocation23_spill] sm:$0xff] %v2792_v34 }
 0x130   : > { %v2808_v40 = vpop.permute.xlu0 %1400 }
 0x131   : > { %3575 = vst [vmem:[#allocation28_spill] sm:$0xff] %v2808_v40 }
 0x132   : > { %893 = vmax.xlane.f32.xlu1 %v892_v3  ;;  %v2796_v8 = vpop.permute.xlu1 %1380 }
 0x133   : > { %3572 = vst [vmem:[#allocation25_spill] sm:$0xff] %v2796_v8 }
 0x134   : > { %v2812_v34 = vpop.permute.xlu0 %1410 }
 0x135   : > { %3577 = vst [vmem:[#allocation30_spill] sm:$0xff] %v2812_v34 }
 0x136   : > { %v2806_v63 = vpop.permute.xlu1 %1385 }
 0x137   : > { %3574 = vst [vmem:[#allocation27_spill] sm:$0xff] %v2806_v63 }
 0x138   : > { %v2816_v42 = vpop.permute.xlu0 %1420 }
 0x139   : > { %3579 = vst [vmem:[#allocation32_spill] sm:$0xff] %v2816_v42 }
 0x13a   : > { %v2810_v3 = vpop.permute.xlu1 %1395 }
 0x13b   : > { %3576 = vst [vmem:[#allocation29_spill] sm:$0xff] %v2810_v3 }
 0x13c   : > { %v2820_v47 = vpop.permute.xlu0 %1430 }
 0x13d   : > { %3581 = vst [vmem:[#allocation34_spill] sm:$0xff] %v2820_v47 }
 0x13e   : > { %v2814_v8 = vpop.permute.xlu1 %1405 }
 0x13f   : > { %3578 = vst [vmem:[#allocation31_spill] sm:$0xff] %v2814_v8 }
 0x142   : > { %v2818_v48 = vpop.permute.xlu1 %1415 }
 0x143   : > { %1485 = vperm.xlu1 %1953, %v1339_v55   ;;  %3580 = vst [vmem:[#allocation33_spill] sm:$0xff] %v2818_v48  ;;  %v2824_v55 = vpop.permute.xlu0 %1440 }
 0x144   : > { %1490 = vperm.xlu0 %1952, %v1340_v15   ;;  %3583 = vst [vmem:[#allocation36_spill] sm:$0xff] %v2824_v55 }
 0x146   : > { %v2822_v54 = vpop.permute.xlu1 %1425 }
 0x147   : > { %3582 = vst [vmem:[#allocation35_spill] sm:$0xff] %v2822_v54  ;;  %v2828_v63 = vpop.permute.xlu0 %1450 }
 0x148   : > { %3585 = vst [vmem:[#allocation38_spill] sm:$0xff] %v2828_v63 }
 0x14a   : > { %v2826_v15 = vpop.permute.xlu1 %1435 }
 0x14b   : > { %3584 = vst [vmem:[#allocation37_spill] sm:$0xff] %v2826_v15  ;;  %v2832_v3 = vpop.permute.xlu0 %1460 }
 0x14c   : > { %3587 = vst [vmem:[#allocation40_spill] sm:$0xff] %v2832_v3 }
 0x14e   : > { %v2830_v40 = vpop.permute.xlu1 %1445 }
 0x14f   : > { %3586 = vst [vmem:[#allocation39_spill] sm:$0xff] %v2830_v40  ;;  %v2836_v8 = vpop.permute.xlu0 %1470 }
 0x150   : > { %3589 = vst [vmem:[#allocation42_spill] sm:$0xff] %v2836_v8 }
 0x152   : > { %v2834_v34 = vpop.permute.xlu1 %1455 }
 0x153   : > { %3588 = vst [vmem:[#allocation41_spill] sm:$0xff] %v2834_v34  ;;  %v2840_v48 = vpop.permute.xlu0 %1480 }
 0x154   : > { %3591 = vst [vmem:[#allocation44_spill] sm:$0xff] %v2840_v48 }
 0x156   : > { %v2838_v42 = vpop.permute.xlu1 %1465 }
 0x157   : > { %3590 = vst [vmem:[#allocation43_spill] sm:$0xff] %v2838_v42 }
 0x15a   : > { %v2842_v47 = vpop.permute.xlu1 %1475 }
 0x15b   : > { %3592 = vst [vmem:[#allocation45_spill] sm:$0xff] %v2842_v47 }
 0x17b   : > { %v801_v54 = vpop.xlane.xlu0 %800 }
 0x17c   : > { %v2845_v55 = vsub.f32 %v2527_v60, %v801_v54  ;;  %v2848_v63 = vsub.f32 %v2530_v61, %v801_v54 }
 0x17e   : > { %3593 = vst [vmem:[#allocation46_spill] sm:$0xff] %v2848_v63  ;;  %v959_v40 = vmul.f32 1.442695, %v2845_v55  ;;  %v961_v3 = vmul.f32 1.442695, %v2848_v63 }
 0x17f   : > { %v852_v34 = vpop.xlane.xlu1 %851  ;;  %v849_v15 = vpop.xlane.xlu0 %848 }
 0x180   : > { %1976 = vpow2.f32 %v959_v40  ;;  %v2853_v8 = vsub.f32 %v2541_v5, %v852_v34  ;;  %v2856_v48 = vsub.f32 %v2544_v6, %v852_v34  ;;  %v2859_v47 = vsub.f32 %v2533_v0, %v849_v15 }
 0x181   : > { %1978 = vpow2.f32 %v961_v3  ;;  %v2862_v60 = vsub.f32 %v2536_v1, %v849_v15 }
 0x182   : > { %3594 = vst [vmem:[#allocation47_spill] sm:$0xff] %v2856_v48  ;;  %v1027_v61 = vmul.f32 1.442695, %v2853_v8  ;;  %v1029_v54 = vmul.f32 1.442695, %v2856_v48 }
 0x183   : > { %v1023_v42 = vmul.f32 1.442695, %v2859_v47  ;;  %v1025_v40 = vmul.f32 1.442695, %v2862_v60  ;;  %v807_v5 = vpop.xlane.xlu1 %806  ;;  %v804_v63 = vpop.xlane.xlu0 %803 }
 0x184   : > { %1980 = vpow2.f32 %v1027_v61  ;;  %v2869_v6 = vsub.f32 %v2550_v10, %v807_v5  ;;  %v2872_v0 = vsub.f32 %v2560_v16, %v807_v5  ;;  %v2875_v1 = vsub.f32 %v2557_v13, %v804_v63 }
 0x185   : > { %1982 = vpow2.f32 %v1029_v54  ;;  %v2878_v34 = vsub.f32 %v2547_v9, %v804_v63 }
 0x186   : > { %1984 = vpow2.f32 %v1023_v42  ;;  %v967_v3 = vmul.f32 1.442695, %v2869_v6  ;;  %v969_v15 = vmul.f32 1.442695, %v2872_v0  ;;  %v963_v61 = vmul.f32 1.442695, %v2875_v1 }
 0x187   : > { %1986 = vpow2.f32 %v1025_v40  ;;  %v965_v10 = vmul.f32 1.442695, %v2878_v34  ;;  %v810_v48 = vpop.xlane.xlu1 %809  ;;  %v855_v16 = vpop.xlane.xlu0 %854 }
 0x188   : > { %1988 = vpow2.f32 %v967_v3  ;;  %v2885_v13 = vsub.f32 %v2573_v25, %v810_v48  ;;  %v2888_v54 = vsub.f32 %v2576_v26, %v810_v48  ;;  %v2891_v9 = vsub.f32 %v2563_v17, %v855_v16 }
 0x189   : > { %1990 = vpow2.f32 %v969_v15  ;;  %v2894_v42 = vsub.f32 %v2566_v18, %v855_v16 }
 0x18a   : > { %3595 = vst [vmem:[#allocation48_spill] sm:$0xff] %v2888_v54  ;;  %1992 = vpow2.f32 %v963_v61  ;;  %v971_v63 = vmul.f32 1.442695, %v2885_v13  ;;  %v973_v40 = vmul.f32 1.442695, %v2888_v54 }
 0x18b   : > { %v1031_v5 = vmul.f32 1.442695, %v2891_v9  ;;  %1994 = vpow2.f32 %v965_v10  ;;  %v1033_v25 = vmul.f32 1.442695, %v2894_v42  ;;  %v858_v3 = vpop.xlane.xlu1 %857  ;;  %v813_v26 = vpop.xlane.xlu0 %812 }
 0x18c   : > { %1996 = vpow2.f32 %v971_v63  ;;  %v2901_v17 = vsub.f32 %v2581_v30, %v858_v3  ;;  %v2904_v48 = vsub.f32 %v2587_v32, %v858_v3  ;;  %v2907_v18 = vsub.f32 %v2584_v31, %v813_v26 }
 0x18d   : > { %v1977_v15 = vpop.eup %1976  ;;  %1998 = vpow2.f32 %v973_v40  ;;  %v2910_v61 = vsub.f32 %v2592_v36, %v813_v26 }
 0x18e   : > { %3596 = vst [vmem:[#allocation49_spill] sm:$0xff] %v2901_v17  ;;  %3597 = vst [vmem:[#allocation50_spill] sm:$0xff] %v2904_v48  ;;  %v1979_v10 = vpop.eup %1978  ;;  %2000 = vpow2.f32 %v1031_v5  ;;  %v1035_v16 = vmul.f32 1.442695, %v2901_v17  ;;  %v1037_v63 = vmul.f32 1.442695, %v2904_v48 }
 0x18f   : > { %v975_v30 = vmul.f32 1.442695, %v2907_v18  ;;  %2002 = vpow2.f32 %v1033_v25  ;;  %v977_v32 = vmul.f32 1.442695, %v2910_v61  ;;  %v816_v3 = vpop.xlane.xlu1 %815  ;;  %v861_v54 = vpop.xlane.xlu0 %860  ;;  %v1087_v31 = vadd.f32 %v1979_v10, %v1977_v15 }
 0x190   : > { %2004 = vpow2.f32 %v1035_v16  ;;  %v2917_v40 = vsub.f32 %v2605_v45, %v816_v3  ;;  %v2920_v36 = vsub.f32 %v2608_v46, %v816_v3  ;;  %v2923_v5 = vsub.f32 %v2595_v37, %v861_v54 }
 0x191   : > { %v2925_v26 = vpop.eup %1980  ;;  %2006 = vpow2.f32 %v1037_v63  ;;  %v2928_v25 = vsub.f32 %v2598_v38, %v861_v54  ;;  %1088 = vadd.xlane.f32.xlu0 %v1087_v31 }
 0x192   : > { %3598 = vst [vmem:[#allocation51_spill] sm:$0xff] %v2917_v40  ;;  %3599 = vst [vmem:[#allocation52_spill] sm:$0xff] %v2920_v36  ;;  %v1983_v48 = vpop.eup %1982  ;;  %2008 = vpow2.f32 %v975_v30  ;;  %v979_v15 = vmul.f32 1.442695, %v2917_v40  ;;  %v981_v45 = vmul.f32 1.442695, %v2920_v36 }
 0x193   : > { %3600 = vst [vmem:[#allocation53_spill] sm:$0xff] %v2923_v5  ;;  %3601 = vst [vmem:[#allocation54_spill] sm:$0xff] %v2928_v25  ;;  %v1039_v10 = vmul.f32 1.442695, %v2923_v5  ;;  %v1985_v46 = vpop.eup %1984  ;;  %2010 = vpow2.f32 %v977_v32  ;;  %v1041_v37 = vmul.f32 1.442695, %v2928_v25  ;;  %v864_v16 = vpop.xlane.xlu1 %863 }
 0x194   : > { %v819_v3 = vpop.xlane.xlu0 %818  ;;  %v1987_v17 = vpop.eup %1986  ;;  %2012 = vpow2.f32 %v979_v15  ;;  %v2935_v38 = vsub.f32 %v2613_v50, %v864_v16  ;;  %v2938_v54 = vsub.f32 %v2619_v52, %v864_v16 }
 0x195   : > { %v2941_v63 = vsub.f32 %v2616_v51, %v819_v3  ;;  %v1989_v30 = vpop.eup %1988  ;;  %2014 = vpow2.f32 %v981_v45  ;;  %v2944_v31 = vsub.f32 %v2624_v58, %v819_v3  ;;  %v1135_v32 = vadd.f32 %v1987_v17, %v1985_v46 }
 0x196   : > { %v1991_v36 = vpop.eup %1990  ;;  %2016 = vpow2.f32 %v1039_v10  ;;  %v1043_v40 = vmul.f32 1.442695, %v2935_v38  ;;  %v1045_v15 = vmul.f32 1.442695, %v2938_v54 }
 0x197   : > { %v983_v50 = vmul.f32 1.442695, %v2941_v63  ;;  %v1993_v25 = vpop.eup %1992  ;;  %2018 = vpow2.f32 %v1041_v37  ;;  %v985_v52 = vmul.f32 1.442695, %v2944_v31  ;;  %1136 = vadd.xlane.f32.xlu0 %v1135_v32  ;;  %v822_v51 = vpop.xlane.xlu1 %821  ;;  %v1093_v45 = vadd.f32 %v1991_v36, %v1989_v30 }
 0x198   : > { %v867_v16 = vpop.xlane.xlu0 %866  ;;  %v1995_v5 = vpop.eup %1994  ;;  %2020 = vpow2.f32 %v1043_v40  ;;  %v2951_v58 = vsub.f32 %v2637_v11, %v822_v51  ;;  %v2954_v17 = vsub.f32 %v2640_v12, %v822_v51 }
 0x199   : > { %v2957_v10 = vsub.f32 %v2627_v59, %v867_v16  ;;  %v1997_v46 = vpop.eup %1996  ;;  %2022 = vpow2.f32 %v1045_v15  ;;  %v2960_v37 = vsub.f32 %v2630_v62, %v867_v16  ;;  %v1090_v3 = vadd.f32 %v1995_v5, %v1993_v25 }
 0x19a   : > { %v1999_v32 = vpop.eup %1998  ;;  %2024 = vpow2.f32 %v983_v50  ;;  %v987_v36 = vmul.f32 1.442695, %v2951_v58  ;;  %v989_v40 = vmul.f32 1.442695, %v2954_v17  ;;  %v1138_v16 = vadd.f32 %v1983_v48, %v2925_v26 }
 0x19b   : > { %v1047_v11 = vmul.f32 1.442695, %v2957_v10  ;;  %v2001_v30 = vpop.eup %2000  ;;  %2026 = vpow2.f32 %v985_v52  ;;  %v1049_v12 = vmul.f32 1.442695, %v2960_v37  ;;  %1094 = vadd.xlane.f32.xlu0 %v1093_v45  ;;  %1091 = vadd.xlane.f32.xlu1 %v1090_v3  ;;  %v870_v59 = vpop.xlane.xlu1 %869 }
 0x19c   : > { %v825_v15 = vpop.xlane.xlu0 %824  ;;  %v2003_v51 = vpop.eup %2002  ;;  %2028 = vpow2.f32 %v987_v36  ;;  %v2967_v62 = vsub.f32 %v2645_v20, %v870_v59  ;;  %v2970_v5 = vsub.f32 %v2651_v22, %v870_v59 }
 0x19d   : > { %v2973_v25 = vsub.f32 %v2648_v21, %v825_v15  ;;  %v2005_v50 = vpop.eup %2004  ;;  %2030 = vpow2.f32 %v989_v40  ;;  %v2976_v52 = vsub.f32 %v2656_v28, %v825_v15  ;;  %v1141_v45 = vadd.f32 %v2003_v51, %v2001_v30 }
 0x19e   : > { %3602 = vst [vmem:[#allocation55_spill] sm:$0xff] %v2970_v5  ;;  %v2007_v3 = vpop.eup %2006  ;;  %2032 = vpow2.f32 %v1047_v11  ;;  %v1051_v36 = vmul.f32 1.442695, %v2967_v62  ;;  %v1053_v20 = vmul.f32 1.442695, %v2970_v5  ;;  %v1096_v51 = vadd.f32 %v1999_v32, %v1997_v46 }
 0x19f   : > { %v991_v22 = vmul.f32 1.442695, %v2973_v25  ;;  %v2009_v59 = vpop.eup %2008  ;;  %2034 = vpow2.f32 %v1049_v12  ;;  %v993_v21 = vmul.f32 1.442695, %v2976_v52  ;;  %1139 = vadd.xlane.f32.xlu1 %v1138_v16  ;;  %1142 = vadd.xlane.f32.xlu0 %v1141_v45  ;;  %v828_v40 = vpop.xlane.xlu1 %827 }
 0x1a0   : > { %v873_v28 = vpop.xlane.xlu0 %872  ;;  %v2011_v15 = vpop.eup %2010  ;;  %2036 = vpow2.f32 %v1051_v36  ;;  %v2984_v48 = vsub.f32 %v2669_v43, %v828_v40  ;;  %v2987_v26 = vsub.f32 %v2672_v44, %v828_v40 }
 0x1a1   : > { %v2990_v11 = vsub.f32 %v2659_v29, %v873_v28  ;;  %v2013_v30 = vpop.eup %2012  ;;  %2038 = vpow2.f32 %v1053_v20  ;;  %v2993_v12 = vsub.f32 %v2662_v33, %v873_v28  ;;  %v1099_v16 = vadd.f32 %v2011_v15, %v2009_v59 }
 0x1a2   : > { %v2015_v45 = vpop.eup %2014  ;;  %2040 = vpow2.f32 %v991_v22  ;;  %v995_v36 = vmul.f32 1.442695, %v2984_v48  ;;  %v997_v43 = vmul.f32 1.442695, %v2987_v26  ;;  %v1144_v28 = vadd.f32 %v2007_v3, %v2005_v50 }
 0x1a3   : > { %v1055_v5 = vmul.f32 1.442695, %v2990_v11  ;;  %v2017_v44 = vpop.eup %2016  ;;  %2042 = vpow2.f32 %v993_v21  ;;  %v1057_v29 = vmul.f32 1.442695, %v2993_v12  ;;  %1097 = vadd.xlane.f32.xlu1 %v1096_v51  ;;  %1100 = vadd.xlane.f32.xlu0 %v1099_v16  ;;  %v876_v20 = vpop.xlane.xlu1 %875 }
 0x1a4   : > { %v831_v40 = vpop.xlane.xlu0 %830  ;;  %v2019_v33 = vpop.eup %2018  ;;  %2044 = vpow2.f32 %v995_v36  ;;  %v3000_v46 = vsub.f32 %v2677_v53, %v876_v20  ;;  %v3003_v32 = vsub.f32 %v2683_v57, %v876_v20 }
 0x1a5   : > { %v3006_v22 = vsub.f32 %v2680_v56, %v831_v40  ;;  %v2021_v59 = vpop.eup %2020  ;;  %2046 = vpow2.f32 %v997_v43  ;;  %v3009_v21 = vsub.f32 %v2688_v4, %v831_v40  ;;  %v1147_v15 = vadd.f32 %v2019_v33, %v2017_v44 }
 0x1a6   : > { %3603 = vst [vmem:[#allocation56_spill] sm:$0xff] %v3000_v46  ;;  %3604 = vst [vmem:[#allocation57_spill] sm:$0xff] %v3003_v32  ;;  %v2023_v51 = vpop.eup %2022  ;;  %2048 = vpow2.f32 %v1055_v5  ;;  %v1059_v16 = vmul.f32 1.442695, %v3000_v46  ;;  %v1061_v53 = vmul.f32 1.442695, %v3003_v32  ;;  %v1102_v33 = vadd.f32 %v2015_v45, %v2013_v30 }
 0x1a7   : > { %3605 = vst [vmem:[#allocation58_spill] sm:$0xff] %v3009_v21  ;;  %v999_v36 = vmul.f32 1.442695, %v3006_v22  ;;  %v2025_v57 = vpop.eup %2024  ;;  %2050 = vpow2.f32 %v1057_v29  ;;  %v1001_v56 = vmul.f32 1.442695, %v3009_v21  ;;  %1145 = vadd.xlane.f32.xlu1 %v1144_v28  ;;  %1148 = vadd.xlane.f32.xlu0 %v1147_v15  ;;  %v834_v43 = vpop.xlane.xlu1 %833  ;;  %v3609_v29 = vld [vmem:[#allocation7_spill] sm:$0xff] }
 0x1a8   : > { %v879_v20 = vpop.xlane.xlu0 %878  ;;  %v2027_v4 = vpop.eup %2026  ;;  %2052 = vpow2.f32 %v1059_v16  ;;  %v3016_v50 = vsub.f32 %v2703_v35, %v834_v43  ;;  %v3019_v5 = vsub.f32 %v2706_v39, %v834_v43  ;;  %v3611_v30 = vld [vmem:[#allocation9_spill] sm:$0xff] }
 0x1a9   : > { %v3022_v3 = vsub.f32 %v2691_v7, %v879_v20  ;;  %v2029_v44 = vpop.eup %2028  ;;  %2054 = vpow2.f32 %v1061_v53  ;;  %v3025_v40 = vsub.f32 %v3609_v29, %v879_v20  ;;  %v1105_v28 = vadd.f32 %v2027_v4, %v2025_v57  ;;  %v3615_v4 = vld [vmem:[#allocation10_spill] sm:$0xff] }
 0x1aa   : > { %3606 = vst [vmem:[#allocation59_spill] sm:$0xff] %v3016_v50  ;;  %3607 = vst [vmem:[#allocation60_spill] sm:$0xff] %v3019_v5  ;;  %v2031_v15 = vpop.eup %2030  ;;  %2056 = vpow2.f32 %v999_v36  ;;  %v1003_v16 = vmul.f32 1.442695, %v3016_v50  ;;  %v1005_v35 = vmul.f32 1.442695, %v3019_v5 }
 0x1ab   : > { %3608 = vst [vmem:[#allocation61_spill] sm:$0xff] %v3022_v3  ;;  %3610 = vst [vmem:[#allocation7_spill] sm:$0xff] %v3025_v40  ;;  %v1063_v32 = vmul.f32 1.442695, %v3022_v3  ;;  %v2033_v39 = vpop.eup %2032  ;;  %2058 = vpow2.f32 %v1001_v56  ;;  %v1065_v7 = vmul.f32 1.442695, %v3025_v40  ;;  %1103 = vadd.xlane.f32.xlu1 %v1102_v33  ;;  %1106 = vadd.xlane.f32.xlu0 %v1105_v28  ;;  %v882_v53 = vpop.xlane.xlu1 %881  ;;  %v1150_v33 = vadd.f32 %v2023_v51, %v2021_v59 }
 0x1ac   : > { %v837_v43 = vpop.xlane.xlu0 %836  ;;  %v2035_v20 = vpop.eup %2034  ;;  %2060 = vpow2.f32 %v1003_v16  ;;  %v3032_v45 = vsub.f32 %v3611_v30, %v882_v53  ;;  %v3613_v36 = vld [vmem:[#allocation11_spill] sm:$0xff]  ;;  %v3617_v56 = vld [vmem:[#allocation12_spill] sm:$0xff]  ;;  %v3620_v51 = vld [vmem:[#allocation17_spill] sm:$0xff] }
 0x1ad   : > { %v3035_v57 = vsub.f32 %v3613_v36, %v882_v53  ;;  %v3038_v29 = vsub.f32 %v3615_v4, %v837_v43  ;;  %v2037_v5 = vpop.eup %2036  ;;  %2062 = vpow2.f32 %v1005_v35  ;;  %v3041_v50 = vsub.f32 %v3617_v56, %v837_v43  ;;  %v3619_v56 = vld [vmem:[#allocation16_spill] sm:$0xff] }
 0x1ae   : > { %3612 = vst [vmem:[#allocation9_spill] sm:$0xff] %v3032_v45  ;;  %v1153_v28 = vadd.f32 %v2035_v20, %v2033_v39  ;;  %v2039_v40 = vpop.eup %2038  ;;  %2064 = vpow2.f32 %v1063_v32  ;;  %v1067_v16 = vmul.f32 1.442695, %v3032_v45  ;;  %v3622_v39 = vld [vmem:[#allocation13_spill] sm:$0xff] }
 0x1af   : > { %3614 = vst [vmem:[#allocation11_spill] sm:$0xff] %v3035_v57  ;;  %3616 = vst [vmem:[#allocation10_spill] sm:$0xff] %v3038_v29  ;;  %v1007_v30 = vmul.f32 1.442695, %v3038_v29  ;;  %v2041_v3 = vpop.eup %2040  ;;  %2066 = vpow2.f32 %v1065_v7  ;;  %v1009_v53 = vmul.f32 1.442695, %v3041_v50  ;;  %1151 = vadd.xlane.f32.xlu1 %v1150_v33  ;;  %v840_v36 = vpop.xlane.xlu1 %839  ;;  %v1108_v33 = vadd.f32 %v2031_v15, %v2029_v44 }
 0x1b0   : > { %3618 = vst [vmem:[#allocation12_spill] sm:$0xff] %v3041_v50  ;;  %1154 = vadd.xlane.f32.xlu0 %v1153_v28  ;;  %v885_v4 = vpop.xlane.xlu0 %884  ;;  %v2043_v35 = vpop.eup %2042  ;;  %v1069_v43 = vmul.f32 1.442695, %v3035_v57  ;;  %v3048_v59 = vsub.f32 %v3619_v56, %v840_v36  ;;  %v3051_v32 = vsub.f32 %v3620_v51, %v840_v36  ;;  %2068 = vpow2.f32 %v1067_v16  ;;  %v3623_v7 = vld [vmem:[#allocation14_spill] sm:$0xff] }
 0x1b1   : > { %v3054_v20 = vsub.f32 %v3622_v39, %v885_v4  ;;  %v2045_v45 = vpop.eup %2044  ;;  %v3057_v50 = vsub.f32 %v3623_v7, %v885_v4  ;;  %v1111_v28 = vadd.f32 %v2043_v35, %v2041_v3  ;;  %2070 = vpow2.f32 %v1007_v30  ;;  %v3625_v35 = vld [vmem:[#allocation20_spill] sm:$0xff] }
 0x1b2   : > { %3621 = vst [vmem:[#allocation16_spill] sm:$0xff] %v3051_v32  ;;  %v2047_v29 = vpop.eup %2046  ;;  %v1011_v57 = vmul.f32 1.442695, %v3048_v59  ;;  %2072 = vpow2.f32 %v1009_v53  ;;  %v1156_v16 = vadd.f32 %v2039_v40, %v2037_v5  ;;  %v1013_v44 = vmul.f32 1.442695, %v3051_v32  ;;  %v3624_v53 = vld [vmem:[#allocation18_spill] sm:$0xff] }
 0x1b3   : > { %v1071_v56 = vmul.f32 1.442695, %v3054_v20  ;;  %v2049_v46 = vpop.eup %2048  ;;  %v1073_v36 = vmul.f32 1.442695, %v3057_v50  ;;  %1109 = vadd.xlane.f32.xlu1 %v1108_v33  ;;  %v888_v51 = vpop.xlane.xlu1 %887  ;;  %2074 = vpow2.f32 %v1069_v43 }
 0x1b4   : > { %1112 = vadd.xlane.f32.xlu0 %v1111_v28  ;;  %v843_v39 = vpop.xlane.xlu0 %842  ;;  %v2051_v21 = vpop.eup %2050  ;;  %v3064_v3 = vsub.f32 %v2745_v49, %v888_v51  ;;  %2076 = vpow2.f32 %v1011_v57  ;;  %v3070_v4 = vsub.f32 %v3624_v53, %v888_v51  ;;  %v1114_v57 = vadd.f32 %v2047_v29, %v2045_v45 }
 0x1b5   : > { %v3067_v15 = vsub.f32 %v2748_v14, %v843_v39  ;;  %v2053_v30 = vpop.eup %2052  ;;  %v3073_v7 = vsub.f32 %v3625_v35, %v843_v39  ;;  %v1159_v33 = vadd.f32 %v2051_v21, %v2049_v46  ;;  %2078 = vpow2.f32 %v1071_v56 }
 0x1b6   : > { %v2055_v5 = vpop.eup %2054  ;;  %2080 = vpow2.f32 %v1073_v36  ;;  %v1075_v51 = vmul.f32 1.442695, %v3064_v3  ;;  %v1077_v56 = vmul.f32 1.442695, %v3070_v4 }
 0x1b7   : > { %v1015_v40 = vmul.f32 1.442695, %v3067_v15  ;;  %v2057_v43 = vpop.eup %2056  ;;  %v1017_v49 = vmul.f32 1.442695, %v3073_v7  ;;  %1157 = vadd.xlane.f32.xlu1 %v1156_v16  ;;  %v846_v14 = vpop.xlane.xlu1 %845  ;;  %2082 = vpow2.f32 %v1013_v44 }
 0x1b8   : > { %1160 = vadd.xlane.f32.xlu0 %v1159_v33  ;;  %v891_v28 = vpop.xlane.xlu0 %890  ;;  %v2059_v32 = vpop.eup %2058  ;;  %v3079_v39 = vsub.f32 %v2771_v2, %v846_v14  ;;  %v3086_v36 = vsub.f32 %v2774_v27, %v846_v14 }
 0x1b9   : > { %v3082_v46 = vsub.f32 %v2761_v19, %v891_v28  ;;  %v2061_v21 = vpop.eup %2060  ;;  %v3089_v16 = vsub.f32 %v2764_v24, %v891_v28  ;;  %v1117_v45 = vadd.f32 %v2059_v32, %v2057_v43  ;;  %2084 = vpow2.f32 %v1015_v40 }
 0x1ba   : > { %v2063_v29 = vpop.eup %2062  ;;  %2086 = vpow2.f32 %v1017_v49  ;;  %v1019_v27 = vmul.f32 1.442695, %v3079_v39  ;;  %v1162_v24 = vadd.f32 %v2055_v5, %v2053_v30  ;;  %v1021_v32 = vmul.f32 1.442695, %v3086_v36 }
 0x1bb   : > { %v1079_v44 = vmul.f32 1.442695, %v3082_v46  ;;  %v2065_v53 = vpop.eup %2064  ;;  %v1081_v2 = vmul.f32 1.442695, %v3089_v16  ;;  %1115 = vadd.xlane.f32.xlu1 %v1114_v57  ;;  %v894_v19 = vpop.xlane.xlu1 %893  ;;  %2088 = vpow2.f32 %v1075_v51  ;;  %v1120_v5 = vadd.f32 %v2063_v29, %v2061_v21 }
 0x1bc   : > { %1118 = vadd.xlane.f32.xlu0 %v1117_v45  ;;  %v2067_v35 = vpop.eup %2066  ;;  %v3095_v33 = vsub.f32 %v2779_v23, %v894_v19  ;;  %2090 = vpow2.f32 %v1077_v56  ;;  %v3099_v40 = vsub.f32 %v2782_v41, %v894_v19 }
 0x1bd   : > { %v1165_v43 = vadd.f32 %v2067_v35, %v2065_v53  ;;  %v2069_v49 = vpop.eup %2068  ;;  %2092 = vpow2.f32 %v1079_v44 }
 0x1be   : > { %v2071_v14 = vpop.eup %2070  ;;  %2094 = vpow2.f32 %v1081_v2  ;;  %v1083_v57 = vmul.f32 1.442695, %v3095_v33  ;;  %v1085_v30 = vmul.f32 1.442695, %v3099_v40 }
 0x1bf   : > { %1163 = vadd.xlane.f32.xlu1 %v1162_v24  ;;  %v2073_v28 = vpop.eup %2072  ;;  %2096 = vpow2.f32 %v1019_v27 }
 0x1c0   : > { %1166 = vadd.xlane.f32.xlu0 %v1165_v43  ;;  %v2075_v23 = vpop.eup %2074  ;;  %2098 = vpow2.f32 %v1021_v32  ;;  %v1123_v51 = vadd.f32 %v2073_v28, %v2071_v14 }
 0x1c1   : > { %v2077_v56 = vpop.eup %2076  ;;  %2100 = vpow2.f32 %v1083_v57  ;;  %v1168_v53 = vadd.f32 %v2075_v23, %v2069_v49 }
 0x1c2   : > { %v2079_v41 = vpop.eup %2078  ;;  %2102 = vpow2.f32 %v1085_v30 }
 0x1c3   : > { %1121 = vadd.xlane.f32.xlu1 %v1120_v5  ;;  %v2081_v45 = vpop.eup %2080 }
 0x1c4   : > { %1124 = vadd.xlane.f32.xlu0 %v1123_v51  ;;  %v2083_v44 = vpop.eup %2082  ;;  %v1171_v2 = vadd.f32 %v2081_v45, %v2079_v41  ;;  %v1341_v41 = vld [vmem:[%s3489_s4 + $0xf0] sm:$0xff]  ;;  %v3109_v45 = vpop.permute.xlu0 %1490 }
 0x1c5   : > { %v1126_v24 = vadd.f32 %v2083_v44, %v2077_v56  ;;  %v1342_v56 = vld [vmem:[%s3489_s4 + $0xf8] sm:$0xff] }
 0x1c6   : > { %v2085_v19 = vpop.eup %2084 }
 0x1c7   : > { %1169 = vadd.xlane.f32.xlu1 %v1168_v53  ;;  %v2087_v35 = vpop.eup %2086  ;;  %v3111_v53 = vpop.permute.xlu1 %1485 }
 0x1c8   : > { %1172 = vadd.xlane.f32.xlu0 %v1171_v2  ;;  %v2089_v27 = vpop.eup %2088  ;;  %v1129_v32 = vadd.f32 %v2087_v35, %v2085_v19 }
 0x1c9   : > { %v2091_v43 = vpop.eup %2090 }
 0x1ca   : > { %v2093_v21 = vpop.eup %2092  ;;  %v1174_v28 = vadd.f32 %v2091_v43, %v2089_v27 }
 0x1cb   : > { %1127 = vadd.xlane.f32.xlu1 %v1126_v24  ;;  %v2095_v29 = vpop.eup %2094 }
 0x1cc   : > { %1130 = vadd.xlane.f32.xlu0 %v1129_v32  ;;  %v2097_v14 = vpop.eup %2096  ;;  %v1177_v5 = vadd.f32 %v2095_v29, %v2093_v21  ;;  %v3626_v29 = vld [vmem:[#allocation46_spill] sm:$0xff] }
 0x1cd   : > { %v2099_v57 = vpop.eup %2098 }
 0x1ce   : > { %v2101_v49 = vpop.eup %2100  ;;  %v1132_v23 = vadd.f32 %v2099_v57, %v2097_v14  ;;  %v3627_v57 = vld [vmem:[#allocation24_spill] sm:$0xff] }
 0x1cf   : > { %1175 = vadd.xlane.f32.xlu1 %v1174_v28  ;;  %v2103_v30 = vpop.eup %2102 }
 0x1d0   : > { %1178 = vadd.xlane.f32.xlu0 %v1177_v5  ;;  %v1180_v51 = vadd.f32 %v2103_v30, %v2101_v49 }
 0x1d3   : > { %1133 = vadd.xlane.f32.xlu1 %v1132_v23 }
 0x1d7   : > { %1181 = vadd.xlane.f32.xlu1 %v1180_v51 }
 0x1e6   : > { %1500 = vperm.xlu0 %1952, %v1342_v56  }
 0x1e8   : > { %1495 = vperm.xlu1 %1953, %v1341_v41  }
 0x21a   : > { %v1089_v44 = vpop.xlane.xlu0 %1088 }
 0x21b   : > { %2104 = vlog2.f32 %v1089_v44 }
 0x220   : > { %v1137_v2 = vpop.xlane.xlu0 %1136 }
 0x221   : > { %2106 = vlog2.f32 %v1137_v2 }
 0x224   : > { %v1092_v19 = vpop.xlane.xlu1 %1091  ;;  %v1095_v35 = vpop.xlane.xlu0 %1094 }
 0x225   : > { %2108 = vlog2.f32 %v1092_v19 }
 0x226   : > { %2110 = vlog2.f32 %v1095_v35  ;;  %v3628_v35 = vld [vmem:[#allocation35_spill] sm:$0xff] }
 0x228   : > { %v2105_v27 = vpop.eup %2104  ;;  %v1140_v24 = vpop.xlane.xlu1 %1139 }
 0x229   : > { %v1143_v32 = vpop.xlane.xlu0 %1142  ;;  %v1184_v43 = vmul.f32 0.6931472, %v2105_v27  ;;  %2112 = vlog2.f32 %v1140_v24 }
 0x22a   : > { %2114 = vlog2.f32 %v1143_v32 }
 0x22b   : > { %v1247_v21 = vsub.f32 %v2845_v55, %v1184_v43  ;;  %v1248_v14 = vsub.f32 %v3626_v29, %v1184_v43 }
 0x22c   : > { %v1098_v28 = vpop.xlane.xlu1 %1097 }
 0x22d   : > { %v1101_v5 = vpop.xlane.xlu0 %1100  ;;  %v1503_v49 = vmul.f32 %v3627_v57, %v1247_v21  ;;  %v1504_v23 = vmul.f32 %v3627_v57, %v1248_v14  ;;  %2116 = vlog2.f32 %v1098_v28 }
 0x22e   : > { %v2107_v30 = vpop.eup %2106  ;;  %2118 = vlog2.f32 %v1101_v5 }
 0x22f   : > { %1567 = vst [vmem:[%s2353_s0] sm:$0xff] %v1503_v49  ;;  %1568 = vst [vmem:[%s2353_s0 + $0x8] sm:$0xff] %v1504_v23  ;;  %v1216_v51 = vmul.f32 0.6931472, %v2107_v30  ;;  %v3629_v49 = vld [vmem:[#allocation8_spill] sm:$0xff] }
 0x230   : > { %v1146_v56 = vpop.xlane.xlu1 %1145 }
 0x231   : > { %v1149_v41 = vpop.xlane.xlu0 %1148  ;;  %v1279_v55 = vsub.f32 %v2859_v47, %v1216_v51  ;;  %v1280_v44 = vsub.f32 %v2862_v60, %v1216_v51  ;;  %2120 = vlog2.f32 %v1146_v56 }
 0x232   : > { %v2109_v2 = vpop.eup %2108  ;;  %2122 = vlog2.f32 %v1149_v41 }
 0x233   : > { %v2111_v19 = vpop.eup %2110  ;;  %v1535_v27 = vmul.f32 %v3628_v35, %v1279_v55  ;;  %v1536_v24 = vmul.f32 %v3628_v35, %v1280_v44  ;;  %v1186_v32 = vmul.f32 0.6931472, %v2109_v2 }
 0x234   : > { %v1188_v43 = vmul.f32 0.6931472, %v2111_v19  ;;  %v1104_v21 = vpop.xlane.xlu1 %1103 }
 0x235   : > { %v1107_v29 = vpop.xlane.xlu0 %1106  ;;  %1599 = vst [vmem:[%s2353_s0 + $0x100] sm:$0xff] %v1535_v27  ;;  %1600 = vst [vmem:[%s2353_s0 + $0x108] sm:$0xff] %v1536_v24  ;;  %v1249_v14 = vsub.f32 %v2875_v1, %v1186_v32  ;;  %v1250_v47 = vsub.f32 %v2878_v34, %v1186_v32  ;;  %2124 = vlog2.f32 %v1104_v21  ;;  %v3630_v1 = vld [vmem:[#allocation15_spill] sm:$0xff]  ;;  %v3632_v32 = vld [vmem:[#allocation34_spill] sm:$0xff] }
 0x236   : > { %v2113_v60 = vpop.eup %2112  ;;  %v1251_v28 = vsub.f32 %v2869_v6, %v1188_v43  ;;  %v1252_v5 = vsub.f32 %v2872_v0, %v1188_v43  ;;  %2126 = vlog2.f32 %v1107_v29  ;;  %v3631_v0 = vld [vmem:[#allocation47_spill] sm:$0xff]  ;;  %v3633_v29 = vld [vmem:[#allocation37_spill] sm:$0xff] }
 0x237   : > { %v2115_v57 = vpop.eup %2114  ;;  %v1505_v23 = vmul.f32 %v3629_v49, %v1249_v14  ;;  %v1506_v30 = vmul.f32 %v3629_v49, %v1250_v47  ;;  %v1218_v51 = vmul.f32 0.6931472, %v2113_v60 }
 0x238   : > { %v1507_v56 = vmul.f32 %v3630_v1, %v1251_v28  ;;  %v1508_v34 = vmul.f32 %v3630_v1, %v1252_v5  ;;  %v1220_v41 = vmul.f32 0.6931472, %v2115_v57  ;;  %v1152_v55 = vpop.xlane.xlu1 %1151  ;;  %v3635_v1 = vld [vmem:[#allocation19_spill] sm:$0xff] }
 0x239   : > { %v1155_v44 = vpop.xlane.xlu0 %1154  ;;  %1569 = vst [vmem:[%s2353_s0 + $0x10] sm:$0xff] %v1505_v23  ;;  %1570 = vst [vmem:[%s2353_s0 + $0x18] sm:$0xff] %v1506_v30  ;;  %v1281_v6 = vsub.f32 %v2853_v8, %v1218_v51  ;;  %v1282_v2 = vsub.f32 %v3631_v0, %v1218_v51  ;;  %2128 = vlog2.f32 %v1152_v55 }
 0x23a   : > { %v2117_v19 = vpop.eup %2116  ;;  %1571 = vst [vmem:[%s2353_s0 + $0x20] sm:$0xff] %v1507_v56  ;;  %1572 = vst [vmem:[%s2353_s0 + $0x28] sm:$0xff] %v1508_v34  ;;  %v1283_v35 = vsub.f32 %v2891_v9, %v1220_v41  ;;  %v1284_v27 = vsub.f32 %v2894_v42, %v1220_v41  ;;  %2130 = vlog2.f32 %v1155_v44  ;;  %v3634_v42 = vld [vmem:[#allocation48_spill] sm:$0xff]  ;;  %v3636_v41 = vld [vmem:[#allocation21_spill] sm:$0xff] }
 0x23b   : > { %v2119_v24 = vpop.eup %2118  ;;  %v1537_v43 = vmul.f32 %v3632_v32, %v1281_v6  ;;  %v1538_v8 = vmul.f32 %v3632_v32, %v1282_v2  ;;  %v1190_v21 = vmul.f32 0.6931472, %v2117_v19  ;;  %v3638_v19 = vld [vmem:[#allocation50_spill] sm:$0xff] }
 0x23c   : > { %v1539_v14 = vmul.f32 %v3633_v29, %v1283_v35  ;;  %v1540_v47 = vmul.f32 %v3633_v29, %v1284_v27  ;;  %v1192_v60 = vmul.f32 0.6931472, %v2119_v24  ;;  %v1110_v28 = vpop.xlane.xlu1 %1109  ;;  %v3639_v24 = vld [vmem:[#allocation53_spill] sm:$0xff]  ;;  %v3641_v29 = vld [vmem:[#allocation36_spill] sm:$0xff] }
 0x23d   : > { %v1113_v5 = vpop.xlane.xlu0 %1112  ;;  %1601 = vst [vmem:[%s2353_s0 + $0x110] sm:$0xff] %v1537_v43  ;;  %1602 = vst [vmem:[%s2353_s0 + $0x118] sm:$0xff] %v1538_v8  ;;  %v1253_v9 = vsub.f32 %v2885_v13, %v1190_v21  ;;  %v1254_v57 = vsub.f32 %v3634_v42, %v1190_v21  ;;  %2132 = vlog2.f32 %v1110_v28  ;;  %v3640_v43 = vld [vmem:[#allocation54_spill] sm:$0xff]  ;;  %v3642_v28 = vld [vmem:[#allocation39_spill] sm:$0xff] }
 0x23e   : > { %v2121_v49 = vpop.eup %2120  ;;  %1603 = vst [vmem:[%s2353_s0 + $0x120] sm:$0xff] %v1539_v14  ;;  %1604 = vst [vmem:[%s2353_s0 + $0x128] sm:$0xff] %v1540_v47  ;;  %v1255_v23 = vsub.f32 %v2907_v18, %v1192_v60  ;;  %v1256_v30 = vsub.f32 %v2910_v61, %v1192_v60  ;;  %2134 = vlog2.f32 %v1113_v5  ;;  %v3637_v18 = vld [vmem:[#allocation49_spill] sm:$0xff] }
 0x23f   : > { %v2123_v51 = vpop.eup %2122  ;;  %v1509_v56 = vmul.f32 %v3635_v1, %v1253_v9  ;;  %v1510_v13 = vmul.f32 %v3635_v1, %v1254_v57  ;;  %v1222_v34 = vmul.f32 0.6931472, %v2121_v49 }
 0x240   : > { %v1511_v55 = vmul.f32 %v3636_v41, %v1255_v23  ;;  %v1512_v44 = vmul.f32 %v3636_v41, %v1256_v30  ;;  %v1224_v6 = vmul.f32 0.6931472, %v2123_v51  ;;  %v1158_v0 = vpop.xlane.xlu1 %1157  ;;  %v3643_v23 = vld [vmem:[#allocation51_spill] sm:$0xff]  ;;  %v3644_v51 = vld [vmem:[#allocation52_spill] sm:$0xff] }
 0x241   : > { %v1161_v2 = vpop.xlane.xlu0 %1160  ;;  %1573 = vst [vmem:[%s2353_s0 + $0x30] sm:$0xff] %v1509_v56  ;;  %1574 = vst [vmem:[%s2353_s0 + $0x38] sm:$0xff] %v1510_v13  ;;  %v1285_v61 = vsub.f32 %v3637_v18, %v1222_v34  ;;  %v1286_v35 = vsub.f32 %v3638_v19, %v1222_v34  ;;  %2136 = vlog2.f32 %v1158_v0 }
 0x242   : > { %v2125_v27 = vpop.eup %2124  ;;  %1575 = vst [vmem:[%s2353_s0 + $0x40] sm:$0xff] %v1511_v55  ;;  %1576 = vst [vmem:[%s2353_s0 + $0x48] sm:$0xff] %v1512_v44  ;;  %v1287_v32 = vsub.f32 %v3639_v24, %v1224_v6  ;;  %v1288_v8 = vsub.f32 %v3640_v43, %v1224_v6  ;;  %2138 = vlog2.f32 %v1161_v2  ;;  %v3645_v55 = vld [vmem:[#allocation22_spill] sm:$0xff]  ;;  %v3646_v2 = vld [vmem:[#allocation23_spill] sm:$0xff] }
 0x243   : > { %v2127_v21 = vpop.eup %2126  ;;  %v1541_v14 = vmul.f32 %v3641_v29, %v1285_v61  ;;  %v1542_v47 = vmul.f32 %v3641_v29, %v1286_v35  ;;  %v1194_v60 = vmul.f32 0.6931472, %v2125_v27 }
 0x244   : > { %v1543_v5 = vmul.f32 %v3642_v28, %v1287_v32  ;;  %v1544_v9 = vmul.f32 %v3642_v28, %v1288_v8  ;;  %v1196_v42 = vmul.f32 0.6931472, %v2127_v21  ;;  %v1116_v57 = vpop.xlane.xlu1 %1115  ;;  %v3647_v21 = vld [vmem:[#allocation38_spill] sm:$0xff] }
 0x245   : > { %v1119_v49 = vpop.xlane.xlu0 %1118  ;;  %1605 = vst [vmem:[%s2353_s0 + $0x130] sm:$0xff] %v1541_v14  ;;  %1606 = vst [vmem:[%s2353_s0 + $0x138] sm:$0xff] %v1542_v47  ;;  %v1257_v30 = vsub.f32 %v3643_v23, %v1194_v60  ;;  %v1258_v1 = vsub.f32 %v3644_v51, %v1194_v60  ;;  %2140 = vlog2.f32 %v1116_v57 }
 0x246   : > { %v2129_v56 = vpop.eup %2128  ;;  %1607 = vst [vmem:[%s2353_s0 + $0x140] sm:$0xff] %v1543_v5  ;;  %1608 = vst [vmem:[%s2353_s0 + $0x148] sm:$0xff] %v1544_v9  ;;  %v1259_v13 = vsub.f32 %v2941_v63, %v1196_v42  ;;  %v1260_v34 = vsub.f32 %v2944_v31, %v1196_v42  ;;  %2142 = vlog2.f32 %v1119_v49 }
 0x247   : > { %v2131_v41 = vpop.eup %2130  ;;  %v1513_v44 = vmul.f32 %v3645_v55, %v1257_v30  ;;  %v1514_v6 = vmul.f32 %v3645_v55, %v1258_v1  ;;  %v1226_v0 = vmul.f32 0.6931472, %v2129_v56  ;;  %v3649_v30 = vld [vmem:[#allocation25_spill] sm:$0xff] }
 0x248   : > { %v1515_v18 = vmul.f32 %v3646_v2, %v1259_v13  ;;  %v1516_v61 = vmul.f32 %v3646_v2, %v1260_v34  ;;  %v1228_v19 = vmul.f32 0.6931472, %v2131_v41  ;;  %v1164_v35 = vpop.xlane.xlu1 %1163 }
 0x249   : > { %v1167_v27 = vpop.xlane.xlu0 %1166  ;;  %1577 = vst [vmem:[%s2353_s0 + $0x50] sm:$0xff] %v1513_v44  ;;  %1578 = vst [vmem:[%s2353_s0 + $0x58] sm:$0xff] %v1514_v6  ;;  %v1289_v63 = vsub.f32 %v2935_v38, %v1226_v0  ;;  %v1290_v31 = vsub.f32 %v2938_v54, %v1226_v0  ;;  %2144 = vlog2.f32 %v1164_v35  ;;  %v3648_v54 = vld [vmem:[#allocation41_spill] sm:$0xff] }
 0x24a   : > { %v2133_v24 = vpop.eup %2132  ;;  %1579 = vst [vmem:[%s2353_s0 + $0x60] sm:$0xff] %v1515_v18  ;;  %1580 = vst [vmem:[%s2353_s0 + $0x68] sm:$0xff] %v1516_v61  ;;  %v1291_v32 = vsub.f32 %v2957_v10, %v1228_v19  ;;  %v1292_v43 = vsub.f32 %v2960_v37, %v1228_v19  ;;  %2146 = vlog2.f32 %v1167_v27  ;;  %v3652_v61 = vld [vmem:[#allocation40_spill] sm:$0xff]  ;;  %v3653_v27 = vld [vmem:[#allocation43_spill] sm:$0xff] }
 0x24b   : > { %v2135_v8 = vpop.eup %2134  ;;  %v1545_v29 = vmul.f32 %v3647_v21, %v1289_v63  ;;  %v1546_v38 = vmul.f32 %v3647_v21, %v1290_v31  ;;  %v1198_v14 = vmul.f32 0.6931472, %v2133_v24 }
 0x24c   : > { %v1547_v47 = vmul.f32 %v3648_v54, %v1291_v32  ;;  %v1548_v60 = vmul.f32 %v3648_v54, %v1292_v43  ;;  %v1200_v28 = vmul.f32 0.6931472, %v2135_v8  ;;  %v1122_v5 = vpop.xlane.xlu1 %1121  ;;  %v3655_v54 = vld [vmem:[#allocation26_spill] sm:$0xff] }
 0x24d   : > { %v1125_v9 = vpop.xlane.xlu0 %1124  ;;  %1609 = vst [vmem:[%s2353_s0 + $0x150] sm:$0xff] %v1545_v29  ;;  %1610 = vst [vmem:[%s2353_s0 + $0x158] sm:$0xff] %v1546_v38  ;;  %v1261_v10 = vsub.f32 %v2951_v58, %v1198_v14  ;;  %v1262_v37 = vsub.f32 %v2954_v17, %v1198_v14  ;;  %2148 = vlog2.f32 %v1122_v5  ;;  %v3650_v17 = vld [vmem:[#allocation27_spill] sm:$0xff]  ;;  %v3654_v29 = vld [vmem:[#allocation58_spill] sm:$0xff] }
 0x24e   : > { %v2137_v42 = vpop.eup %2136  ;;  %1611 = vst [vmem:[%s2353_s0 + $0x160] sm:$0xff] %v1547_v47  ;;  %1612 = vst [vmem:[%s2353_s0 + $0x168] sm:$0xff] %v1548_v60  ;;  %v1263_v57 = vsub.f32 %v2973_v25, %v1200_v28  ;;  %v1264_v49 = vsub.f32 %v2976_v52, %v1200_v28  ;;  %2150 = vlog2.f32 %v1125_v9  ;;  %v3651_v52 = vld [vmem:[#allocation55_spill] sm:$0xff] }
 0x24f   : > { %v2139_v23 = vpop.eup %2138  ;;  %v1517_v51 = vmul.f32 %v3649_v30, %v1261_v10  ;;  %v1518_v58 = vmul.f32 %v3649_v30, %v1262_v37  ;;  %v1230_v1 = vmul.f32 0.6931472, %v2137_v42  ;;  %v3659_v30 = vld [vmem:[#allocation61_spill] sm:$0xff] }
 0x250   : > { %v1519_v56 = vmul.f32 %v3650_v17, %v1263_v57  ;;  %v1520_v13 = vmul.f32 %v3650_v17, %v1264_v49  ;;  %v1232_v34 = vmul.f32 0.6931472, %v2139_v23  ;;  %v1170_v41 = vpop.xlane.xlu1 %1169  ;;  %v3658_v57 = vld [vmem:[#allocation57_spill] sm:$0xff] }
 0x251   : > { %v1173_v55 = vpop.xlane.xlu0 %1172  ;;  %1581 = vst [vmem:[%s2353_s0 + $0x70] sm:$0xff] %v1517_v51  ;;  %1582 = vst [vmem:[%s2353_s0 + $0x78] sm:$0xff] %v1518_v58  ;;  %v1293_v25 = vsub.f32 %v2967_v62, %v1230_v1  ;;  %v1294_v44 = vsub.f32 %v3651_v52, %v1230_v1  ;;  %2152 = vlog2.f32 %v1170_v41  ;;  %v3660_v58 = vld [vmem:[#allocation7_spill] sm:$0xff] }
 0x252   : > { %v2141_v6 = vpop.eup %2140  ;;  %1583 = vst [vmem:[%s2353_s0 + $0x80] sm:$0xff] %v1519_v56  ;;  %1584 = vst [vmem:[%s2353_s0 + $0x88] sm:$0xff] %v1520_v13  ;;  %v1295_v0 = vsub.f32 %v2990_v11, %v1232_v34  ;;  %v1296_v2 = vsub.f32 %v2993_v12, %v1232_v34  ;;  %2154 = vlog2.f32 %v1173_v55  ;;  %v3661_v56 = vld [vmem:[#allocation42_spill] sm:$0xff]  ;;  %v3662_v55 = vld [vmem:[#allocation45_spill] sm:$0xff] }
 0x253   : > { %v2143_v18 = vpop.eup %2142  ;;  %v1549_v19 = vmul.f32 %v3652_v61, %v1293_v25  ;;  %v1550_v62 = vmul.f32 %v3652_v61, %v1294_v44  ;;  %v1202_v35 = vmul.f32 0.6931472, %v2141_v6 }
 0x254   : > { %v1551_v63 = vmul.f32 %v3653_v27, %v1295_v0  ;;  %v1552_v31 = vmul.f32 %v3653_v27, %v1296_v2  ;;  %v1204_v24 = vmul.f32 0.6931472, %v2143_v18  ;;  %v1128_v32 = vpop.xlane.xlu1 %1127  ;;  %v3663_v0 = vld [vmem:[#allocation59_spill] sm:$0xff]  ;;  %v3664_v18 = vld [vmem:[#allocation60_spill] sm:$0xff] }
 0x255   : > { %v1131_v43 = vpop.xlane.xlu0 %1130  ;;  %1613 = vst [vmem:[%s2353_s0 + $0x170] sm:$0xff] %v1549_v19  ;;  %1614 = vst [vmem:[%s2353_s0 + $0x178] sm:$0xff] %v1550_v62  ;;  %v1265_v11 = vsub.f32 %v2984_v48, %v1202_v35  ;;  %v1266_v12 = vsub.f32 %v2987_v26, %v1202_v35  ;;  %2156 = vlog2.f32 %v1128_v32  ;;  %v3656_v26 = vld [vmem:[#allocation29_spill] sm:$0xff]  ;;  %v3665_v62 = vld [vmem:[#allocation10_spill] sm:$0xff] }
 0x256   : > { %v2145_v8 = vpop.eup %2144  ;;  %1615 = vst [vmem:[%s2353_s0 + $0x180] sm:$0xff] %v1551_v63  ;;  %1616 = vst [vmem:[%s2353_s0 + $0x188] sm:$0xff] %v1552_v31  ;;  %v1267_v21 = vsub.f32 %v3006_v22, %v1204_v24  ;;  %v1268_v38 = vsub.f32 %v3654_v29, %v1204_v24  ;;  %2158 = vlog2.f32 %v1131_v43  ;;  %v3657_v22 = vld [vmem:[#allocation56_spill] sm:$0xff] }
 0x257   : > { %v2147_v14 = vpop.eup %2146  ;;  %v1521_v47 = vmul.f32 %v3655_v54, %v1265_v11  ;;  %v1522_v48 = vmul.f32 %v3655_v54, %v1266_v12  ;;  %v1234_v60 = vmul.f32 0.6931472, %v2145_v8  ;;  %v3666_v27 = vld [vmem:[#allocation12_spill] sm:$0xff]  ;;  %v3668_v12 = vld [vmem:[#allocation31_spill] sm:$0xff] }
 0x258   : > { %v1523_v28 = vmul.f32 %v3656_v26, %v1267_v21  ;;  %v1524_v5 = vmul.f32 %v3656_v26, %v1268_v38  ;;  %v1236_v9 = vmul.f32 0.6931472, %v2147_v14  ;;  %v1176_v10 = vpop.xlane.xlu1 %1175  ;;  %v3667_v24 = vld [vmem:[#allocation28_spill] sm:$0xff]  ;;  %v3669_v14 = vld [vmem:[#allocation9_spill] sm:$0xff] }
 0x259   : > { %v1179_v37 = vpop.xlane.xlu0 %1178  ;;  %1585 = vst [vmem:[%s2353_s0 + $0x90] sm:$0xff] %v1521_v47  ;;  %1586 = vst [vmem:[%s2353_s0 + $0x98] sm:$0xff] %v1522_v48  ;;  %v1297_v42 = vsub.f32 %v3657_v22, %v1234_v60  ;;  %v1298_v49 = vsub.f32 %v3658_v57, %v1234_v60  ;;  %2160 = vlog2.f32 %v1176_v10  ;;  %v3670_v47 = vld [vmem:[#allocation11_spill] sm:$0xff] }
 0x25a   : > { %v2149_v23 = vpop.eup %2148  ;;  %1587 = vst [vmem:[%s2353_s0 + $0xa0] sm:$0xff] %v1523_v28  ;;  %1588 = vst [vmem:[%s2353_s0 + $0xa8] sm:$0xff] %v1524_v5  ;;  %v1299_v51 = vsub.f32 %v3659_v30, %v1236_v9  ;;  %v1300_v1 = vsub.f32 %v3660_v58, %v1236_v9  ;;  %2162 = vlog2.f32 %v1179_v37  ;;  %v3671_v9 = vld [vmem:[#allocation44_spill] sm:$0xff] }
 0x25b   : > { %v2151_v17 = vpop.eup %2150  ;;  %v1553_v13 = vmul.f32 %v3661_v56, %v1297_v42  ;;  %v1554_v34 = vmul.f32 %v3661_v56, %v1298_v49  ;;  %v1206_v41 = vmul.f32 0.6931472, %v2149_v23 }
 0x25c   : > { %v1555_v25 = vmul.f32 %v3662_v55, %v1299_v51  ;;  %v1556_v52 = vmul.f32 %v3662_v55, %v1300_v1  ;;  %v1208_v44 = vmul.f32 0.6931472, %v2151_v17  ;;  %v1134_v6 = vpop.xlane.xlu1 %1133 }
 0x25d   : > { %1617 = vst [vmem:[%s2353_s0 + $0x190] sm:$0xff] %v1553_v13  ;;  %1618 = vst [vmem:[%s2353_s0 + $0x198] sm:$0xff] %v1554_v34  ;;  %v1269_v2 = vsub.f32 %v3663_v0, %v1206_v41  ;;  %v1270_v61 = vsub.f32 %v3664_v18, %v1206_v41  ;;  %2164 = vlog2.f32 %v1134_v6  ;;  %v3674_v34 = vld [vmem:[#allocation33_spill] sm:$0xff] }
 0x25e   : > { %v2153_v19 = vpop.eup %2152  ;;  %1619 = vst [vmem:[%s2353_s0 + $0x1a0] sm:$0xff] %v1555_v25  ;;  %1620 = vst [vmem:[%s2353_s0 + $0x1a8] sm:$0xff] %v1556_v52  ;;  %v1271_v35 = vsub.f32 %v3665_v62, %v1208_v44  ;;  %v1272_v63 = vsub.f32 %v3666_v27, %v1208_v44 }
 0x25f   : > { %v2155_v31 = vpop.eup %2154  ;;  %v1525_v32 = vmul.f32 %v3667_v24, %v1269_v2  ;;  %v1526_v43 = vmul.f32 %v3667_v24, %v1270_v61  ;;  %v1238_v11 = vmul.f32 0.6931472, %v2153_v19 }
 0x260   : > { %v1527_v8 = vmul.f32 %v3668_v12, %v1271_v35  ;;  %v1528_v21 = vmul.f32 %v3668_v12, %v1272_v63  ;;  %v1240_v29 = vmul.f32 0.6931472, %v2155_v31  ;;  %v1182_v38 = vpop.xlane.xlu1 %1181 }
 0x261   : > { %1589 = vst [vmem:[%s2353_s0 + $0xb0] sm:$0xff] %v1525_v32  ;;  %1590 = vst [vmem:[%s2353_s0 + $0xb8] sm:$0xff] %v1526_v43  ;;  %v1301_v54 = vsub.f32 %v3669_v14, %v1238_v11  ;;  %v1302_v48 = vsub.f32 %v3670_v47, %v1238_v11  ;;  %2166 = vlog2.f32 %v1182_v38  ;;  %v1501_v31 = vpop.permute.xlu0 %1500 }
 0x262   : > { %v2157_v60 = vpop.eup %2156  ;;  %1591 = vst [vmem:[%s2353_s0 + $0xc0] sm:$0xff] %v1527_v8  ;;  %1592 = vst [vmem:[%s2353_s0 + $0xc8] sm:$0xff] %v1528_v21  ;;  %v1303_v26 = vsub.f32 %v3054_v20, %v1240_v29  ;;  %v1304_v28 = vsub.f32 %v3057_v50, %v1240_v29  ;;  %v3672_v20 = vld [vmem:[#allocation16_spill] sm:$0xff] }
 0x263   : > { %v2159_v5 = vpop.eup %2158  ;;  %v1557_v10 = vmul.f32 %v3671_v9, %v1301_v54  ;;  %v1558_v37 = vmul.f32 %v3671_v9, %v1302_v48  ;;  %v1210_v22 = vmul.f32 0.6931472, %v2157_v60 }
 0x264   : > { %v1559_v42 = vmul.f32 %v3111_v53, %v1303_v26  ;;  %v1560_v57 = vmul.f32 %v3111_v53, %v1304_v28  ;;  %v1212_v49 = vmul.f32 0.6931472, %v2159_v5  ;;  %v3673_v53 = vld [vmem:[#allocation30_spill] sm:$0xff]  ;;  %v1496_v18 = vpop.permute.xlu1 %1495 }
 0x265   : > { %1621 = vst [vmem:[%s2353_s0 + $0x1b0] sm:$0xff] %v1557_v10  ;;  %1622 = vst [vmem:[%s2353_s0 + $0x1b8] sm:$0xff] %v1558_v37  ;;  %v1273_v23 = vsub.f32 %v3048_v59, %v1210_v22  ;;  %v1274_v30 = vsub.f32 %v3672_v20, %v1210_v22 }
 0x266   : > { %v2161_v50 = vpop.eup %2160  ;;  %1623 = vst [vmem:[%s2353_s0 + $0x1c0] sm:$0xff] %v1559_v42  ;;  %1624 = vst [vmem:[%s2353_s0 + $0x1c8] sm:$0xff] %v1560_v57  ;;  %v1275_v51 = vsub.f32 %v3067_v15, %v1212_v49  ;;  %v1276_v58 = vsub.f32 %v3073_v7, %v1212_v49 }
 0x267   : > { %v2163_v1 = vpop.eup %2162  ;;  %v1529_v17 = vmul.f32 %v3673_v53, %v1273_v23  ;;  %v1530_v56 = vmul.f32 %v3673_v53, %v1274_v30  ;;  %v1242_v13 = vmul.f32 0.6931472, %v2161_v50 }
 0x268   : > { %v1531_v41 = vmul.f32 %v3674_v34, %v1275_v51  ;;  %v1532_v59 = vmul.f32 %v3674_v34, %v1276_v58  ;;  %v1244_v55 = vmul.f32 0.6931472, %v2163_v1 }
 0x269   : > { %1593 = vst [vmem:[%s2353_s0 + $0xd0] sm:$0xff] %v1529_v17  ;;  %1594 = vst [vmem:[%s2353_s0 + $0xd8] sm:$0xff] %v1530_v56  ;;  %v1305_v25 = vsub.f32 %v3064_v3, %v1242_v13  ;;  %v1306_v15 = vsub.f32 %v3070_v4, %v1242_v13 }
 0x26a   : > { %v2165_v7 = vpop.eup %2164  ;;  %1595 = vst [vmem:[%s2353_s0 + $0xe0] sm:$0xff] %v1531_v41  ;;  %1596 = vst [vmem:[%s2353_s0 + $0xe8] sm:$0xff] %v1532_v59  ;;  %v1307_v52 = vsub.f32 %v3082_v46, %v1244_v55  ;;  %v1308_v44 = vsub.f32 %v3089_v16, %v1244_v55  ;;  %v3675_v16 = vld [vmem:[#allocation32_spill] sm:$0xff] }
 0x26b   : > { %v1561_v6 = vmul.f32 %v3109_v45, %v1305_v25  ;;  %v1562_v0 = vmul.f32 %v3109_v45, %v1306_v15  ;;  %v1214_v2 = vmul.f32 0.6931472, %v2165_v7 }
 0x26c   : > { %v1563_v3 = vmul.f32 %v1496_v18, %v1307_v52  ;;  %v1564_v61 = vmul.f32 %v1496_v18, %v1308_v44 }
 0x26d   : > { %1625 = vst [vmem:[%s2353_s0 + $0x1d0] sm:$0xff] %v1561_v6  ;;  %1626 = vst [vmem:[%s2353_s0 + $0x1d8] sm:$0xff] %v1562_v0  ;;  %v1277_v4 = vsub.f32 %v3079_v39, %v1214_v2  ;;  %v1278_v46 = vsub.f32 %v3086_v36, %v1214_v2 }
 0x26e   : > { %v2167_v19 = vpop.eup %2166  ;;  %1627 = vst [vmem:[%s2353_s0 + $0x1e0] sm:$0xff] %v1563_v3  ;;  %1628 = vst [vmem:[%s2353_s0 + $0x1e8] sm:$0xff] %v1564_v61 }
 0x26f   : > { %v1533_v62 = vmul.f32 %v3675_v16, %v1277_v4  ;;  %v1534_v45 = vmul.f32 %v3675_v16, %v1278_v46  ;;  %v1246_v35 = vmul.f32 0.6931472, %v2167_v19 }
 0x271   : > { %1597 = vst [vmem:[%s2353_s0 + $0xf0] sm:$0xff] %v1533_v62  ;;  %1598 = vst [vmem:[%s2353_s0 + $0xf8] sm:$0xff] %v1534_v45  ;;  %v1309_v27 = vsub.f32 %v3095_v33, %v1246_v35  ;;  %v1310_v63 = vsub.f32 %v3099_v40, %v1246_v35 }
 0x273   : > { %v1565_v24 = vmul.f32 %v1501_v31, %v1309_v27  ;;  %v1566_v39 = vmul.f32 %v1501_v31, %v1310_v63 }
 0x275   : > { %1629 = vst [vmem:[%s2353_s0 + $0x1f0] sm:$0xff] %v1565_v24  ;;  %1630 = vst [vmem:[%s2353_s0 + $0x1f8] sm:$0xff] %v1566_v39 }
 0x276 PF: > { %s1631_s10 = sld [smem:[#allocation3]] }
 0x27c   : > { %p1880_p13 = scmp.ne.s32.totalorder %s1631_s10, 0 }
 0x27e   : > { %1635 = sbr.rel (%p1880_p13) target bundleno = 676 (0x2a4), region = 44 }
 0x283   : > { %v2247_v36 = vmov 0.0  }
 0x284   : > { %1636 = vst [vmem:[%s2353_s0] sm:$0xff] %v2247_v36  ;;  %1637 = vst [vmem:[%s2353_s0 + $0x8] sm:$0xff] %v2247_v36 }
 0x285   : > { %1638 = vst [vmem:[%s2353_s0 + $0x10] sm:$0xff] %v2247_v36  ;;  %1639 = vst [vmem:[%s2353_s0 + $0x18] sm:$0xff] %v2247_v36 }
 0x286   : > { %1640 = vst [vmem:[%s2353_s0 + $0x20] sm:$0xff] %v2247_v36  ;;  %1641 = vst [vmem:[%s2353_s0 + $0x28] sm:$0xff] %v2247_v36 }
 0x287   : > { %1642 = vst [vmem:[%s2353_s0 + $0x30] sm:$0xff] %v2247_v36  ;;  %1643 = vst [vmem:[%s2353_s0 + $0x38] sm:$0xff] %v2247_v36 }
 0x288   : > { %1644 = vst [vmem:[%s2353_s0 + $0x40] sm:$0xff] %v2247_v36  ;;  %1645 = vst [vmem:[%s2353_s0 + $0x48] sm:$0xff] %v2247_v36 }
 0x289   : > { %1646 = vst [vmem:[%s2353_s0 + $0x50] sm:$0xff] %v2247_v36  ;;  %1647 = vst [vmem:[%s2353_s0 + $0x58] sm:$0xff] %v2247_v36 }
 0x28a   : > { %1648 = vst [vmem:[%s2353_s0 + $0x60] sm:$0xff] %v2247_v36  ;;  %1649 = vst [vmem:[%s2353_s0 + $0x68] sm:$0xff] %v2247_v36 }
 0x28b   : > { %1650 = vst [vmem:[%s2353_s0 + $0x70] sm:$0xff] %v2247_v36  ;;  %1651 = vst [vmem:[%s2353_s0 + $0x78] sm:$0xff] %v2247_v36 }
 0x28c   : > { %1652 = vst [vmem:[%s2353_s0 + $0x80] sm:$0xff] %v2247_v36  ;;  %1653 = vst [vmem:[%s2353_s0 + $0x88] sm:$0xff] %v2247_v36 }
 0x28d   : > { %1654 = vst [vmem:[%s2353_s0 + $0x90] sm:$0xff] %v2247_v36  ;;  %1655 = vst [vmem:[%s2353_s0 + $0x98] sm:$0xff] %v2247_v36 }
 0x28e   : > { %1656 = vst [vmem:[%s2353_s0 + $0xa0] sm:$0xff] %v2247_v36  ;;  %1657 = vst [vmem:[%s2353_s0 + $0xa8] sm:$0xff] %v2247_v36 }
 0x28f   : > { %1658 = vst [vmem:[%s2353_s0 + $0xb0] sm:$0xff] %v2247_v36  ;;  %1659 = vst [vmem:[%s2353_s0 + $0xb8] sm:$0xff] %v2247_v36 }
 0x290   : > { %1660 = vst [vmem:[%s2353_s0 + $0xc0] sm:$0xff] %v2247_v36  ;;  %1661 = vst [vmem:[%s2353_s0 + $0xc8] sm:$0xff] %v2247_v36 }
 0x291   : > { %1662 = vst [vmem:[%s2353_s0 + $0xd0] sm:$0xff] %v2247_v36  ;;  %1663 = vst [vmem:[%s2353_s0 + $0xd8] sm:$0xff] %v2247_v36 }
 0x292   : > { %1664 = vst [vmem:[%s2353_s0 + $0xe0] sm:$0xff] %v2247_v36  ;;  %1665 = vst [vmem:[%s2353_s0 + $0xe8] sm:$0xff] %v2247_v36 }
 0x293   : > { %1666 = vst [vmem:[%s2353_s0 + $0xf0] sm:$0xff] %v2247_v36  ;;  %1667 = vst [vmem:[%s2353_s0 + $0xf8] sm:$0xff] %v2247_v36 }
 0x294   : > { %1668 = vst [vmem:[%s2353_s0 + $0x100] sm:$0xff] %v2247_v36  ;;  %1669 = vst [vmem:[%s2353_s0 + $0x108] sm:$0xff] %v2247_v36 }
 0x295   : > { %1670 = vst [vmem:[%s2353_s0 + $0x110] sm:$0xff] %v2247_v36  ;;  %1671 = vst [vmem:[%s2353_s0 + $0x118] sm:$0xff] %v2247_v36 }
 0x296   : > { %1672 = vst [vmem:[%s2353_s0 + $0x120] sm:$0xff] %v2247_v36  ;;  %1673 = vst [vmem:[%s2353_s0 + $0x128] sm:$0xff] %v2247_v36 }
 0x297   : > { %1674 = vst [vmem:[%s2353_s0 + $0x130] sm:$0xff] %v2247_v36  ;;  %1675 = vst [vmem:[%s2353_s0 + $0x138] sm:$0xff] %v2247_v36 }
 0x298   : > { %1676 = vst [vmem:[%s2353_s0 + $0x140] sm:$0xff] %v2247_v36  ;;  %1677 = vst [vmem:[%s2353_s0 + $0x148] sm:$0xff] %v2247_v36 }
 0x299   : > { %1678 = vst [vmem:[%s2353_s0 + $0x150] sm:$0xff] %v2247_v36  ;;  %1679 = vst [vmem:[%s2353_s0 + $0x158] sm:$0xff] %v2247_v36 }
 0x29a   : > { %1680 = vst [vmem:[%s2353_s0 + $0x160] sm:$0xff] %v2247_v36  ;;  %1681 = vst [vmem:[%s2353_s0 + $0x168] sm:$0xff] %v2247_v36 }
 0x29b   : > { %1682 = vst [vmem:[%s2353_s0 + $0x170] sm:$0xff] %v2247_v36  ;;  %1683 = vst [vmem:[%s2353_s0 + $0x178] sm:$0xff] %v2247_v36 }
 0x29c   : > { %1684 = vst [vmem:[%s2353_s0 + $0x180] sm:$0xff] %v2247_v36  ;;  %1685 = vst [vmem:[%s2353_s0 + $0x188] sm:$0xff] %v2247_v36 }
 0x29d   : > { %1686 = vst [vmem:[%s2353_s0 + $0x190] sm:$0xff] %v2247_v36  ;;  %1687 = vst [vmem:[%s2353_s0 + $0x198] sm:$0xff] %v2247_v36 }
 0x29e   : > { %1688 = vst [vmem:[%s2353_s0 + $0x1a0] sm:$0xff] %v2247_v36  ;;  %1689 = vst [vmem:[%s2353_s0 + $0x1a8] sm:$0xff] %v2247_v36 }
 0x29f   : > { %1690 = vst [vmem:[%s2353_s0 + $0x1b0] sm:$0xff] %v2247_v36  ;;  %1691 = vst [vmem:[%s2353_s0 + $0x1b8] sm:$0xff] %v2247_v36 }
 0x2a0   : > { %1692 = vst [vmem:[%s2353_s0 + $0x1c0] sm:$0xff] %v2247_v36  ;;  %1693 = vst [vmem:[%s2353_s0 + $0x1c8] sm:$0xff] %v2247_v36 }
 0x2a1   : > { %1694 = vst [vmem:[%s2353_s0 + $0x1d0] sm:$0xff] %v2247_v36  ;;  %1695 = vst [vmem:[%s2353_s0 + $0x1d8] sm:$0xff] %v2247_v36 }
 0x2a2   : > { %1696 = vst [vmem:[%s2353_s0 + $0x1e0] sm:$0xff] %v2247_v36  ;;  %1697 = vst [vmem:[%s2353_s0 + $0x1e8] sm:$0xff] %v2247_v36 }
 0x2a3   : > { %1698 = vst [vmem:[%s2353_s0 + $0x1f0] sm:$0xff] %v2247_v36  ;;  %1699 = vst [vmem:[%s2353_s0 + $0x1f8] sm:$0xff] %v2247_v36 }
 0x2a4 PF: > { %s1887_s11 = sshll.u32 %s2236_s23, 8  ;;  %s1717_s15 = sshll.u32 %s2353_s0, 4  ;;  %s3436_s15 = int_to_ptr.vmem [resolvable:$true] %s1717_s15 }
 0x2a5   : > { %s3433_s14 = scalar_lea.hbm %s3490_s5, %s1887_s11  ;;  %s3440_s19 = scalar_lea.sflag [#allocation5], %s249_s8 }
 0x2a6   : > { %s2168_s16 = scalar_lea.vmem %s3436_s15, 8192  ;;  %s2248_s23 = smov [#allocation4]  }
 0x2a7   : > { %p2169_p0 = scmp.ne.s32.totalorder %s3436_s15, %s2168_s16  ;;  %s2172_s17 = sshll.u32 %s2248_s23, 4  ;;  %s2173_s17 = int_to_ptr.vmem [resolvable:$false] %s2172_s17 }
 0x2a8   : > { %s2174_s18 = scalar_lea.vmem %s2173_s17, 16384  ;;  %p2175_p3 = scmp.lt.s32.totalorder %s3436_s15, %s2173_s17 }
 0x2a9   : > { %p2170_p1 = pnand %p2169_p0, %p2325_p4  ;;  %p2176_p5 = scmp.lt.s32.totalorder %s2174_s18, %s2168_s16 }
 0x2ab   : > { %p2171_p2 = pneg %p2170_p1  ;;  %p2177_p6 = por %p2176_p5, %p2175_p3 }
 0x2ad   : > { %p2178_p7 = pnand %p2177_p6, %p2171_p2 }
 0x2af   : > { %2181 = shalt.err (!%p2178_p7)
}
 0x2b0   : > { %s2182_s8 = scalar_lea.hbm %s3433_s14, 8192  ;;  %s2186_s28 = scalar_lea.hbm %s3490_s5, 32768 }
 0x2b1   : > { %p2183_p9 = scmp.ne.s32.totalorder %s3433_s14, %s2182_s8  ;;  %p2187_p12 = scmp.lt.s32.totalorder %s3433_s14, %s3490_s5 }
 0x2b2   : > { %p2188_p13 = scmp.lt.s32.totalorder %s2186_s28, %s2182_s8 }
 0x2b3   : > { %p2184_p10 = pnand %p2183_p9, %p2325_p4 }
 0x2b4   : > { %p2189_p0 = por %p2188_p13, %p2187_p12 }
 0x2b5   : > { %p2185_p11 = pneg %p2184_p10 }
 0x2b7   : > { %p2190_p1 = pnand %p2189_p0, %p2185_p11 }
 0x2b9   : > { %2193 = shalt.err (!%p2190_p1)
}
 0x2ba   : > { %s2249_s10 = smov 256   ;;  %s2250_s11 = smov 1024  }
 0x2bb   : > { %s2251_s12 = smov 16  }
 0x2bc   : > { %1892 = dma.vmem_to_hbm [thread:$0]  (%p2325_p4), %s3436_s15, 8192, %s3433_s14, %s3440_s19, %s2249_s10, %s2250_s11, %s2251_s12  }
 0x2bd PF: > { %p1898_p2 = scmp.ge.s32.totalorder %s2244_s25, 2  ;;  %s1732_s13 = sand.u32 1, %s2224_s20  }
 0x2be   : > { %s1733_s16 = scalar_lea.sflag [#allocation5], %s1732_s13 }
 0x2bf   : > { %p1895_p3 = pnand %p1898_p2, %p2332_p8 }
 0x2c1   : > { %p1896_p5 = pneg %p1895_p3 }
 0x2c3   : > { %2219 = dma.done.wait (%p1896_p5), %s1733_s16, 8192  }
 0x2c4   : > { %2221 = vsyncadd (%p1896_p5), %s1733_s16, 4294959104  ;;  %s19_s25 = sadd.s32 1, %s2244_s25   ;;  %s3676_s20 = smov %s2228_s21 }
 0x2c5   : > { %p16_p6 = scmp.ge.s32.totalorder %s19_s25, 6   ;;  %s3677_s21 = smov %s2232_s22 }
 0x2c6   : > { %s3678_s22 = smov %s2338_s7  ;;  %s3679_s23 = smov %s2240_s24 }
 0x2c7   : > { %s3680_s24 = smov %s3682_s27  ;;  %18 = sbr.rel (!%p16_p6) target bundleno = 6 (0x6), region = 88 }
 0x2cc   :  { %1738 = vsyncpa [#allocation5], 1 }
 0x2cd   :  { %1740 = vsyncpa [#allocation5 + $0x1], 1 }

</bundles_post_ra>
